<compile_context>
chip_gen: v7x
topology: tpu7x:2x2x1
jax: 0.10.0
libtpu: 0.0.40
codegen_flags: <defaults>
</compile_context>

<pallas_src>
import functools

import jax
import jax.numpy as jnp
from jax.experimental import pallas as pl
from jax.experimental.pallas import tpu as pltpu

_LANE = 128      # vreg lane width
_SUBLANE = 8     # f32 sublane width


def _round_up(x, m):
    return (x + m - 1) // m * m


@functools.lru_cache(maxsize=None)
def _vmem_limit_bytes():
    """Generation-aware scoped-VMEM request: v5e/v6e (128 MiB physical) -> 96 MiB,
    v7x (64 MiB physical) -> 48 MiB.  Conservative fallback if the query fails."""
    try:
        cap = int(pltpu.get_tpu_info().vmem_capacity_bytes)
    except Exception:
        cap = 64 << 20
    return max(32 << 20, cap * 3 // 4)


# --------------------------------------------------------------------------
# Pallas kernel 1: fused Set-Abstraction MLP chain + max-over-K
# --------------------------------------------------------------------------
def _sa_fused_kernel(*refs, n_layers, kp):
    """[TG*Kp, Cin] bf16 -> (matmul+bias+ReLU) x n_layers -> max over Kp -> [TG, Cout]."""
    g_ref, o_ref = refs[0], refs[-1]
    wb = refs[1:-1]
    x = g_ref[...]                                    # bf16; rows = points, lanes = channels
    for li in range(n_layers):
        w = wb[2 * li][...]                           # bf16 [Cin_l, Cout_l], VMEM resident
        b = wb[2 * li + 1][...]                       # f32  [1, Cout_l]
        acc = jnp.dot(x, w, preferred_element_type=jnp.float32)   # MXU, f32 accumulate
        y = jnp.maximum(acc + b, 0.0)                 # folded-BN bias + ReLU (f32, VPU)
        x = y.astype(jnp.bfloat16) if li + 1 < n_layers else y
    rows, cout = x.shape
    # Kp % 8 == 0 -> this f32 sublane split is a free layout view (no relayout).
    pooled = jnp.max(x.reshape(rows // kp, kp, cout), axis=1)
    o_ref[...] = pooled.astype(o_ref.dtype)


def _choose_group_tile(gp, kp, cin, out_ch, weight_bytes, budget):
    """Largest group tile (multiple of 8, dividing gp) whose VMEM footprint
    (double-buffered bf16 input + f32 activations + double-buffered bf16 output
    + resident weights) fits `budget`.  Prefers >= 2 grid steps so the
    "parallel" grid axis can be sharded across v7x's two TensorCores.  Falls
    back to the smallest legal tile instead of silently blowing the budget."""
    def fits(tg):
        in_b = 2 * tg * kp * cin * 2            # bf16 input block, double-buffered
        act_b = tg * kp * sum(out_ch) * 4       # f32 inter-layer activations
        out_b = 2 * tg * out_ch[-1] * 2         # bf16 pooled output, double-buffered
        return weight_bytes + in_b + act_b + out_b <= budget

    cands = [t for t in range(_SUBLANE, gp + 1, _SUBLANE) if gp % t == 0 and fits(t)]
    if not cands:
        return _SUBLANE
    multi = [t for t in cands if gp // t >= 2]
    return max(multi) if multi else max(cands)


def pallas_sa_mlp_groupmax(grouped, mlp_weights, *, pad_out_lanes=False):
    """Fused SA kernel: grouped [G, Kp, Cin] bf16 (Kp % 8 == 0) -> pooled bf16 [G, Cout]."""
    g, kp, cin = grouped.shape
    assert kp % _SUBLANE == 0

    weights = [(w.astype(jnp.bfloat16), b.astype(jnp.float32).reshape(1, -1))
               for w, b in mlp_weights]

    # Zero-pad the last layer's output channels to a multiple of 128 so the HBM
    # store is a full-lane (unmasked) vst; the consumer stage adds matching zero
    # weight rows, so semantics are unchanged.
    if pad_out_lanes:
        w_last, b_last = weights[-1]
        cout_true = w_last.shape[1]
        cpad = _round_up(cout_true, _LANE)
        if cpad != cout_true:
            w_last = jnp.concatenate(
                [w_last, jnp.zeros((w_last.shape[0], cpad - cout_true), w_last.dtype)], axis=1)
            b_last = jnp.concatenate(
                [b_last, jnp.zeros((1, cpad - cout_true), b_last.dtype)], axis=1)
            weights[-1] = (w_last, b_last)

    out_ch = [w.shape[1] for w, _ in weights]
    cout = out_ch[-1]

    # Pad the group axis to a multiple of 8 so it can be tiled legally.
    gp = _round_up(g, _SUBLANE)
    flat = grouped.reshape(g * kp, cin)
    if gp != g:
        flat = jnp.concatenate(
            [flat, jnp.zeros(((gp - g) * kp, cin), flat.dtype)], axis=0)

    vmem_limit = _vmem_limit_bytes()
    weight_bytes = 2 * sum(w.size * 2 + b.size * 4 for w, b in weights)  # double-buffered
    tg = _choose_group_tile(gp, kp, cin, out_ch, weight_bytes,
                            budget=int(vmem_limit * 0.8))
    grid = (gp // tg,)

    in_specs = [pl.BlockSpec((tg * kp, cin), lambda i: (i, 0))]
    args = [flat]
    for w, b in weights:                              # constant block index -> resident in VMEM
        in_specs.append(pl.BlockSpec(w.shape, lambda i: (0, 0)))
        in_specs.append(pl.BlockSpec(b.shape, lambda i: (0, 0)))
        args += [w, b]

    pooled = pl.pallas_call(
        functools.partial(_sa_fused_kernel, n_layers=len(weights), kp=kp),
        out_shape=jax.ShapeDtypeStruct((gp, cout), jnp.bfloat16),
        grid=grid,
        in_specs=in_specs,
        out_specs=pl.BlockSpec((tg, cout), lambda i: (i, 0)),
        compiler_params=pltpu.CompilerParams(
            dimension_semantics=("parallel",),        # shard group tiles over v7x's 2 TCs
            vmem_limit_bytes=vmem_limit),
    )(*args)
    return pooled[:g] if gp != g else pooled


# --------------------------------------------------------------------------
# Pallas kernel 2: fused FC stack (Linear+BN+ReLU ...) + classifier head
# --------------------------------------------------------------------------
def _fc_head_kernel(*refs, n_layers):
    x_ref, o_ref = refs[0], refs[-1]
    wb = refs[1:-1]
    y = x_ref[...]                                    # bf16
    for li in range(n_layers):
        w = wb[2 * li][...]                           # bf16
        b = wb[2 * li + 1][...]                       # f32
        acc = jnp.dot(y, w, preferred_element_type=jnp.float32) + b
        if li + 1 < n_layers:                         # classifier (last layer) has no ReLU/BN
            y = jnp.maximum(acc, 0.0).astype(jnp.bfloat16)
        else:
            y = acc
        # dropout(p=0.5) is identity in eval mode
    o_ref[...] = y.astype(o_ref.dtype)


def pallas_fc_head(x, layers):
    """layers = [(w, b), ...]; ReLU on all but the last.  Single fused kernel,
    all weights resident in VMEM, one HBM write of the logits.
    # TODO(synk): fold this tiny head into the tail of the SA3 kernel to save a launch."""
    n, cin = x.shape
    cout = layers[-1][0].shape[1]
    x = x.astype(jnp.bfloat16)
    in_specs = [pl.BlockSpec((n, cin), lambda i: (0, 0))]
    args = [x]
    for w, b in layers:
        w16 = w.astype(jnp.bfloat16)
        b32 = b.astype(jnp.float32).reshape(1, -1)
        in_specs.append(pl.BlockSpec(w16.shape, lambda i: (0, 0)))
        in_specs.append(pl.BlockSpec(b32.shape, lambda i: (0, 0)))
        args += [w16, b32]
    return pl.pallas_call(
        functools.partial(_fc_head_kernel, n_layers=len(layers)),
        out_shape=jax.ShapeDtypeStruct((n, cout), jnp.float32),
        grid=(1,),
        in_specs=in_specs,
        out_specs=pl.BlockSpec((n, cout), lambda i: (0, 0)),
        compiler_params=pltpu.CompilerParams(vmem_limit_bytes=_vmem_limit_bytes()),
    )(*args)


# --------------------------------------------------------------------------
# Plain-JAX glue: sampling / grouping (data-dependent gathers)
# --------------------------------------------------------------------------
def index_points(points, idx):
    """points [B, N, C], idx [B, ...] -> [B, ..., C]"""
    b = points.shape[0]
    batch_idx = jnp.arange(b).reshape((b,) + (1,) * (idx.ndim - 1))
    return points[batch_idx, idx]


def farthest_point_sample(xyz, n_samples):
    """Deterministic FPS (seed point = index 0). xyz [B, N, 3] -> idx [B, S]."""
    b, n, _ = xyz.shape

    def body(i, state):
        dist, farthest, idxs = state
        idxs = idxs.at[:, i].set(farthest)
        centroid = jnp.take_along_axis(xyz, farthest[:, None, None], axis=1)  # [B,1,3]
        d = jnp.sum((xyz - centroid) ** 2, axis=-1)
        dist = jnp.minimum(dist, d)
        farthest = jnp.argmax(dist, axis=-1).astype(jnp.int32)
        return dist, farthest, idxs

    dist0 = jnp.full((b, n), 1e10, jnp.float32)
    far0 = jnp.zeros((b,), jnp.int32)
    idx0 = jnp.zeros((b, n_samples), jnp.int32)
    _, _, idxs = jax.lax.fori_loop(0, n_samples, body, (dist0, far0, idx0))
    return idxs


def ball_query(radius, k, xyz, new_xyz):
    """First-K-in-index-order points within `radius` (same semantics as the
    reference sort-based query), computed via cumsum + one-hot select."""
    b, n, _ = xyz.shape
    sqr = jnp.sum((new_xyz[:, :, None, :] - xyz[:, None, :, :]) ** 2, axis=-1)  # [B,S,N]
    valid = sqr <= radius ** 2
    rank = jnp.cumsum(valid.astype(jnp.int32), axis=-1) - 1
    sel = valid[..., None] & (rank[..., None] == jnp.arange(k, dtype=jnp.int32))  # [B,S,N,K]
    idx = jnp.sum(sel.astype(jnp.int32)
                  * jnp.arange(n, dtype=jnp.int32)[None, None, :, None], axis=2)  # [B,S,K]
    n_valid = jnp.sum(valid.astype(jnp.int32), axis=-1, keepdims=True)
    first = idx[:, :, :1]    # always valid: each center is itself a member of xyz
    idx = jnp.where(jnp.arange(k, dtype=jnp.int32) < n_valid, idx, first)
    return idx


# --------------------------------------------------------------------------
# Set Abstraction layer (sample + group + fused Pallas MLP/max kernel)
# --------------------------------------------------------------------------
def set_abstraction(xyz, feats, n_samples, radius, k, mlp_weights, *, pad_out_lanes):
    b = xyz.shape[0]
    fps_idx = farthest_point_sample(xyz, n_samples)            # [B,S]
    new_xyz = index_points(xyz, fps_idx)                       # [B,S,3] (f32 for geometry)
    grp_idx = ball_query(radius, k, xyz, new_xyz)              # [B,S,K]
    grouped_xyz = (index_points(xyz, grp_idx)
                   - new_xyz[:, :, None, :]).astype(jnp.bfloat16)   # recentered, bf16 operand
    if feats is not None:
        grouped = jnp.concatenate([grouped_xyz, index_points(feats, grp_idx)], axis=-1)
    else:
        grouped = grouped_xyz                                  # [B,S,K,Cin] bf16

    cin = grouped.shape[-1]
    # If incoming features were lane-padded by the previous stage, add matching
    # zero rows to the first MLP weight (padded channels contribute nothing).
    w0, b0 = mlp_weights[0]
    if w0.shape[0] < cin:
        w0 = jnp.concatenate(
            [w0, jnp.zeros((cin - w0.shape[0], w0.shape[1]), w0.dtype)], axis=0)
        mlp_weights = [(w0, b0)] + list(mlp_weights[1:])

    # Pad K to a multiple of 8 with duplicate members (max-pool invariant) so the
    # in-kernel (rows) -> (groups, Kp) sublane split is a free layout view.
    kp = _round_up(k, _SUBLANE)
    if kp != k:
        grouped = jnp.take(grouped, jnp.arange(kp) % k, axis=2)

    g = b * n_samples
    grouped = grouped.reshape(g, kp, cin)
    new_feats = pallas_sa_mlp_groupmax(grouped, mlp_weights, pad_out_lanes=pad_out_lanes)
    return new_xyz, new_feats.reshape(b, n_samples, -1)


# --------------------------------------------------------------------------
# Parameter construction (deterministic, BN folded; eval-mode semantics)
# --------------------------------------------------------------------------
_EPS = 1e-5


def _conv_bn_params(key, cin, cout):
    k1, k2, k3, k4 = jax.random.split(key, 4)
    w = jax.random.normal(k1, (cin, cout), jnp.float32) * (float(cin) ** -0.5)
    b = jax.random.normal(k2, (cout,), jnp.float32) * 0.01
    gamma = 1.0 + 0.1 * jax.random.normal(k3, (cout,), jnp.float32)
    beta = 0.1 * jax.random.normal(k4, (cout,), jnp.float32)
    run_mean = jnp.zeros((cout,), jnp.float32)
    run_var = jnp.ones((cout,), jnp.float32)
    scale = gamma / jnp.sqrt(run_var + _EPS)
    return w * scale[None, :], (b - run_mean) * scale + beta


def _linear_params(key, cin, cout):
    k1, k2 = jax.random.split(key, 2)
    w = jax.random.normal(k1, (cin, cout), jnp.float32) * (float(cin) ** -0.5)
    b = jax.random.normal(k2, (cout,), jnp.float32) * 0.01
    return w, b


def init_params(key, class_num, cfg, fc_out_channels):
    params = {"sa": [], "fc": []}
    keys = jax.random.split(key, 32)
    ki = 0

    in_ch = 3
    for li in range(3):
        mlp = []
        c = in_ch
        for cout in cfg["sa_mlp_out_channels_list"][li]:
            mlp.append(_conv_bn_params(keys[ki], c, cout)); ki += 1
            c = cout
        params["sa"].append(mlp)
        in_ch = 3 + c  # next SA input: relative xyz (3) + previous (unpadded) features

    last = cfg["sa_mlp_out_channels_list"][2][-1] * cfg["n_samples_list"][2]
    for cout in fc_out_channels:
        params["fc"].append(_conv_bn_params(keys[ki], last, cout)); ki += 1
        last = cout
    params["cls"] = _linear_params(keys[ki], last, class_num)
    return params


# --------------------------------------------------------------------------
# Full forward (matches PointNetPlusCls.forward, eval mode)
# --------------------------------------------------------------------------
def pointnet_plus_cls_forward(params, x, cfg):
    # x: [B, 3, N] (PyTorch convention); transpose(1,2) -> [B, N, 3]
    batch_size = x.shape[0]
    xyz = jnp.transpose(x, (0, 2, 1)).astype(jnp.float32)

    # SA1/SA2 outputs feed another SA stage -> lane-pad their pooled features to
    # 128 for unmasked stores; SA3 feeds the FC head -> keep exact width.
    sa1_xyz, sa1_feats = set_abstraction(
        xyz, None,
        cfg["n_samples_list"][0], cfg["radius_list"][0],
        cfg["n_points_per_group_list"][0], params["sa"][0], pad_out_lanes=True)
    sa2_xyz, sa2_feats = set_abstraction(
        sa1_xyz, sa1_feats,
        cfg["n_samples_list"][1], cfg["radius_list"][1],
        cfg["n_points_per_group_list"][1], params["sa"][1], pad_out_lanes=True)
    _, sa3_feats = set_abstraction(
        sa2_xyz, sa2_feats,
        cfg["n_samples_list"][2], cfg["radius_list"][2],
        cfg["n_points_per_group_list"][2], params["sa"][2], pad_out_lanes=False)

    feats = sa3_feats.reshape(batch_size, -1)
    layers = list(params["fc"]) + [params["cls"]]
    cls_outs = pallas_fc_head(feats, layers)
    return cls_outs, None


# --------------------------------------------------------------------------
if __name__ == "__main__":
    cfg = {
        "n_samples_list": [16, 8, 4],
        "radius_list": [0.4, 0.6, 0.8],
        "n_points_per_group_list": [8, 8, 4],
        "sa_mlp_out_channels_list": [[16, 16, 32], [32, 32, 64], [64, 64, 128]],
    }
    class_num = 5
    fc_out_channels = [64, 32]   # small shapes (PyTorch default is [512, 256])

    key = jax.random.PRNGKey(0)
    pkey, xkey = jax.random.split(key)
    params = init_params(pkey, class_num, cfg, fc_out_channels)

    B, N = 2, 64
    x = jax.random.normal(xkey, (B, 3, N), jnp.float32)  # input: [B, 3, N]

    forward = jax.jit(functools.partial(pointnet_plus_cls_forward, cfg=cfg))
    cls_outs, aux = forward(params, x)
    cls_outs = jax.block_until_ready(cls_outs)
    assert cls_outs.shape == (B, class_num)
    assert bool(jnp.all(jnp.isfinite(cls_outs)))
    assert aux is None
    print("KERNEL_OK")
</pallas_src>

<mosaic_0001>
module attributes {stable_mosaic.version = 11 : i64} {
  func.func @_sa_fused_kernel(%arg0: i32, %arg1: memref<128x3xbf16, #tpu.memory_space<vmem>>, %arg2: memref<3x16xbf16, #tpu.memory_space<vmem>>, %arg3: memref<1x16xf32, #tpu.memory_space<vmem>>, %arg4: memref<16x16xbf16, #tpu.memory_space<vmem>>, %arg5: memref<1x16xf32, #tpu.memory_space<vmem>>, %arg6: memref<16x128xbf16, #tpu.memory_space<vmem>>, %arg7: memref<1x128xf32, #tpu.memory_space<vmem>>, %arg8: memref<16x128xbf16, #tpu.memory_space<vmem>>) attributes {dimension_semantics = [#tpu.dimension_semantics<parallel>], iteration_bounds = array<i64: 2>, scalar_prefetch = 0 : i64, scratch_operands = 0 : i64, tpu.core_type = #tpu.core_type<tc>, window_params = [{transform_indices = @transform_0, window_bounds = array<i64: 128, 3>}, {pipeline_mode = #tpu.pipeline_mode<synchronous>, transform_indices = @transform_1, window_bounds = array<i64: 3, 16>}, {pipeline_mode = #tpu.pipeline_mode<synchronous>, transform_indices = @transform_2, window_bounds = array<i64: 1, 16>}, {pipeline_mode = #tpu.pipeline_mode<synchronous>, transform_indices = @transform_3, window_bounds = array<i64: 16, 16>}, {pipeline_mode = #tpu.pipeline_mode<synchronous>, transform_indices = @transform_4, window_bounds = array<i64: 1, 16>}, {pipeline_mode = #tpu.pipeline_mode<synchronous>, transform_indices = @transform_5, window_bounds = array<i64: 16, 128>}, {pipeline_mode = #tpu.pipeline_mode<synchronous>, transform_indices = @transform_6, window_bounds = array<i64: 1, 128>}, {transform_indices = @transform_7, window_bounds = array<i64: 16, 128>}]} {
    %c0 = arith.constant 0 : index
    %c0_0 = arith.constant 0 : index
    %0 = vector.load %arg1[%c0, %c0_0] : memref<128x3xbf16, #tpu.memory_space<vmem>>, vector<128x3xbf16>
    %c0_1 = arith.constant 0 : index
    %c0_2 = arith.constant 0 : index
    %1 = vector.load %arg2[%c0_1, %c0_2] : memref<3x16xbf16, #tpu.memory_space<vmem>>, vector<3x16xbf16>
    %c0_3 = arith.constant 0 : index
    %c0_4 = arith.constant 0 : index
    %2 = vector.load %arg3[%c0_3, %c0_4] : memref<1x16xf32, #tpu.memory_space<vmem>>, vector<1x16xf32>
    %cst = arith.constant dense<0.000000e+00> : vector<128x16xf32>
    %3 = tpu.matmul %0, %1, %cst {dimension_numbers = #tpu.dot_dimension_numbers<[1], [0], [0], [1], [0, 0, 1, 1], [], []>} : vector<128x3xbf16>, vector<3x16xbf16>, vector<128x16xf32> -> vector<128x16xf32>
    %4 = vector.broadcast %2 : vector<1x16xf32> to vector<128x16xf32>
    %5 = arith.addf %3, %4 : vector<128x16xf32>
    %cst_5 = arith.constant 0.000000e+00 : f32
    %6 = vector.broadcast %cst_5 : f32 to vector<128x16xf32>
    %7 = arith.maximumf %5, %6 : vector<128x16xf32>
    %8 = arith.truncf %7 : vector<128x16xf32> to vector<128x16xbf16>
    %c0_6 = arith.constant 0 : index
    %c0_7 = arith.constant 0 : index
    %9 = vector.load %arg4[%c0_6, %c0_7] : memref<16x16xbf16, #tpu.memory_space<vmem>>, vector<16x16xbf16>
    %c0_8 = arith.constant 0 : index
    %c0_9 = arith.constant 0 : index
    %10 = vector.load %arg5[%c0_8, %c0_9] : memref<1x16xf32, #tpu.memory_space<vmem>>, vector<1x16xf32>
    %cst_10 = arith.constant dense<0.000000e+00> : vector<128x16xf32>
    %11 = tpu.matmul %8, %9, %cst_10 {dimension_numbers = #tpu.dot_dimension_numbers<[1], [0], [0], [1], [0, 0, 1, 1], [], []>} : vector<128x16xbf16>, vector<16x16xbf16>, vector<128x16xf32> -> vector<128x16xf32>
    %12 = vector.broadcast %10 : vector<1x16xf32> to vector<128x16xf32>
    %13 = arith.addf %11, %12 : vector<128x16xf32>
    %cst_11 = arith.constant 0.000000e+00 : f32
    %14 = vector.broadcast %cst_11 : f32 to vector<128x16xf32>
    %15 = arith.maximumf %13, %14 : vector<128x16xf32>
    %16 = arith.truncf %15 : vector<128x16xf32> to vector<128x16xbf16>
    %c0_12 = arith.constant 0 : index
    %c0_13 = arith.constant 0 : index
    %17 = vector.load %arg6[%c0_12, %c0_13] : memref<16x128xbf16, #tpu.memory_space<vmem>>, vector<16x128xbf16>
    %c0_14 = arith.constant 0 : index
    %c0_15 = arith.constant 0 : index
    %18 = vector.load %arg7[%c0_14, %c0_15] : memref<1x128xf32, #tpu.memory_space<vmem>>, vector<1x128xf32>
    %cst_16 = arith.constant dense<0.000000e+00> : vector<128x128xf32>
    %19 = tpu.matmul %16, %17, %cst_16 {dimension_numbers = #tpu.dot_dimension_numbers<[1], [0], [0], [1], [0, 0, 1, 1], [], []>} : vector<128x16xbf16>, vector<16x128xbf16>, vector<128x128xf32> -> vector<128x128xf32>
    %20 = vector.broadcast %18 : vector<1x128xf32> to vector<128x128xf32>
    %21 = arith.addf %19, %20 : vector<128x128xf32>
    %cst_17 = arith.constant 0.000000e+00 : f32
    %22 = vector.broadcast %cst_17 : f32 to vector<128x128xf32>
    %23 = arith.maximumf %21, %22 : vector<128x128xf32>
    %24 = vector.shape_cast %23 : vector<128x128xf32> to vector<16x8x128xf32>
    %cst_18 = arith.constant dense<0xFF800000> : vector<16x128xf32>
    %25 = vector.multi_reduction <maximumf>, %24, %cst_18 [1] : vector<16x8x128xf32> to vector<16x128xf32>
    %26 = arith.truncf %25 : vector<16x128xf32> to vector<16x128xbf16>
    %c0_19 = arith.constant 0 : index
    %c0_20 = arith.constant 0 : index
    %27 = vector.load %arg8[%c0_19, %c0_20] : memref<16x128xbf16, #tpu.memory_space<vmem>>, vector<16x128xbf16>
    tpu.vector_store %arg8[%c0_19, %c0_20], %26 {strides = array<i32>} : memref<16x128xbf16, #tpu.memory_space<vmem>>, vector<16x128xbf16>,
    return
  }
  func.func @transform_0(%arg0: i32) -> (i32, i32) {
    %c0_i32 = arith.constant 0 : i32
    %c0_i32_0 = arith.constant 0 : i32
    return %arg0, %c0_i32 : i32, i32
  }
  func.func @transform_1(%arg0: i32) -> (i32, i32) {
    %c0_i32 = arith.constant 0 : i32
    %c0_i32_0 = arith.constant 0 : i32
    %c0_i32_1 = arith.constant 0 : i32
    return %c0_i32, %c0_i32_0 : i32, i32
  }
  func.func @transform_2(%arg0: i32) -> (i32, i32) {
    %c0_i32 = arith.constant 0 : i32
    %c0_i32_0 = arith.constant 0 : i32
    %c0_i32_1 = arith.constant 0 : i32
    return %c0_i32, %c0_i32_0 : i32, i32
  }
  func.func @transform_3(%arg0: i32) -> (i32, i32) {
    %c0_i32 = arith.constant 0 : i32
    %c0_i32_0 = arith.constant 0 : i32
    %c0_i32_1 = arith.constant 0 : i32
    return %c0_i32, %c0_i32_0 : i32, i32
  }
  func.func @transform_4(%arg0: i32) -> (i32, i32) {
    %c0_i32 = arith.constant 0 : i32
    %c0_i32_0 = arith.constant 0 : i32
    %c0_i32_1 = arith.constant 0 : i32
    return %c0_i32, %c0_i32_0 : i32, i32
  }
  func.func @transform_5(%arg0: i32) -> (i32, i32) {
    %c0_i32 = arith.constant 0 : i32
    %c0_i32_0 = arith.constant 0 : i32
    %c0_i32_1 = arith.constant 0 : i32
    return %c0_i32, %c0_i32_0 : i32, i32
  }
  func.func @transform_6(%arg0: i32) -> (i32, i32) {
    %c0_i32 = arith.constant 0 : i32
    %c0_i32_0 = arith.constant 0 : i32
    %c0_i32_1 = arith.constant 0 : i32
    return %c0_i32, %c0_i32_0 : i32, i32
  }
  func.func @transform_7(%arg0: i32) -> (i32, i32) {
    %c0_i32 = arith.constant 0 : i32
    %c0_i32_0 = arith.constant 0 : i32
    return %arg0, %c0_i32 : i32, i32
  }
}

module attributes {stable_mosaic.version = 11 : i64} {
  func.func @_sa_fused_kernel(%arg0: i32, %arg1: memref<64x131xbf16, #tpu.memory_space<vmem>>, %arg2: memref<131x32xbf16, #tpu.memory_space<vmem>>, %arg3: memref<1x32xf32, #tpu.memory_space<vmem>>, %arg4: memref<32x32xbf16, #tpu.memory_space<vmem>>, %arg5: memref<1x32xf32, #tpu.memory_space<vmem>>, %arg6: memref<32x128xbf16, #tpu.memory_space<vmem>>, %arg7: memref<1x128xf32, #tpu.memory_space<vmem>>, %arg8: memref<8x128xbf16, #tpu.memory_space<vmem>>) attributes {dimension_semantics = [#tpu.dimension_semantics<parallel>], iteration_bounds = array<i64: 2>, scalar_prefetch = 0 : i64, scratch_operands = 0 : i64, tpu.core_type = #tpu.core_type<tc>, window_params = [{transform_indices = @transform_0, window_bounds = array<i64: 64, 131>}, {pipeline_mode = #tpu.pipeline_mode<synchronous>, transform_indices = @transform_1, window_bounds = array<i64: 131, 32>}, {pipeline_mode = #tpu.pipeline_mode<synchronous>, transform_indices = @transform_2, window_bounds = array<i64: 1, 32>}, {pipeline_mode = #tpu.pipeline_mode<synchronous>, transform_indices = @transform_3, window_bounds = array<i64: 32, 32>}, {pipeline_mode = #tpu.pipeline_mode<synchronous>, transform_indices = @transform_4, window_bounds = array<i64: 1, 32>}, {pipeline_mode = #tpu.pipeline_mode<synchronous>, transform_indices = @transform_5, window_bounds = array<i64: 32, 128>}, {pipeline_mode = #tpu.pipeline_mode<synchronous>, transform_indices = @transform_6, window_bounds = array<i64: 1, 128>}, {transform_indices = @transform_7, window_bounds = array<i64: 8, 128>}]} {
    %c0 = arith.constant 0 : index
    %c0_0 = arith.constant 0 : index
    %0 = vector.load %arg1[%c0, %c0_0] : memref<64x131xbf16, #tpu.memory_space<vmem>>, vector<64x131xbf16>
    %c0_1 = arith.constant 0 : index
    %c0_2 = arith.constant 0 : index
    %1 = vector.load %arg2[%c0_1, %c0_2] : memref<131x32xbf16, #tpu.memory_space<vmem>>, vector<131x32xbf16>
    %c0_3 = arith.constant 0 : index
    %c0_4 = arith.constant 0 : index
    %2 = vector.load %arg3[%c0_3, %c0_4] : memref<1x32xf32, #tpu.memory_space<vmem>>, vector<1x32xf32>
    %cst = arith.constant dense<0.000000e+00> : vector<64x32xf32>
    %3 = tpu.matmul %0, %1, %cst {dimension_numbers = #tpu.dot_dimension_numbers<[1], [0], [0], [1], [0, 0, 1, 1], [], []>} : vector<64x131xbf16>, vector<131x32xbf16>, vector<64x32xf32> -> vector<64x32xf32>
    %4 = vector.broadcast %2 : vector<1x32xf32> to vector<64x32xf32>
    %5 = arith.addf %3, %4 : vector<64x32xf32>
    %cst_5 = arith.constant 0.000000e+00 : f32
    %6 = vector.broadcast %cst_5 : f32 to vector<64x32xf32>
    %7 = arith.maximumf %5, %6 : vector<64x32xf32>
    %8 = arith.truncf %7 : vector<64x32xf32> to vector<64x32xbf16>
    %c0_6 = arith.constant 0 : index
    %c0_7 = arith.constant 0 : index
    %9 = vector.load %arg4[%c0_6, %c0_7] : memref<32x32xbf16, #tpu.memory_space<vmem>>, vector<32x32xbf16>
    %c0_8 = arith.constant 0 : index
    %c0_9 = arith.constant 0 : index
    %10 = vector.load %arg5[%c0_8, %c0_9] : memref<1x32xf32, #tpu.memory_space<vmem>>, vector<1x32xf32>
    %cst_10 = arith.constant dense<0.000000e+00> : vector<64x32xf32>
    %11 = tpu.matmul %8, %9, %cst_10 {dimension_numbers = #tpu.dot_dimension_numbers<[1], [0], [0], [1], [0, 0, 1, 1], [], []>} : vector<64x32xbf16>, vector<32x32xbf16>, vector<64x32xf32> -> vector<64x32xf32>
    %12 = vector.broadcast %10 : vector<1x32xf32> to vector<64x32xf32>
    %13 = arith.addf %11, %12 : vector<64x32xf32>
    %cst_11 = arith.constant 0.000000e+00 : f32
    %14 = vector.broadcast %cst_11 : f32 to vector<64x32xf32>
    %15 = arith.maximumf %13, %14 : vector<64x32xf32>
    %16 = arith.truncf %15 : vector<64x32xf32> to vector<64x32xbf16>
    %c0_12 = arith.constant 0 : index
    %c0_13 = arith.constant 0 : index
    %17 = vector.load %arg6[%c0_12, %c0_13] : memref<32x128xbf16, #tpu.memory_space<vmem>>, vector<32x128xbf16>
    %c0_14 = arith.constant 0 : index
    %c0_15 = arith.constant 0 : index
    %18 = vector.load %arg7[%c0_14, %c0_15] : memref<1x128xf32, #tpu.memory_space<vmem>>, vector<1x128xf32>
    %cst_16 = arith.constant dense<0.000000e+00> : vector<64x128xf32>
    %19 = tpu.matmul %16, %17, %cst_16 {dimension_numbers = #tpu.dot_dimension_numbers<[1], [0], [0], [1], [0, 0, 1, 1], [], []>} : vector<64x32xbf16>, vector<32x128xbf16>, vector<64x128xf32> -> vector<64x128xf32>
    %20 = vector.broadcast %18 : vector<1x128xf32> to vector<64x128xf32>
    %21 = arith.addf %19, %20 : vector<64x128xf32>
    %cst_17 = arith.constant 0.000000e+00 : f32
    %22 = vector.broadcast %cst_17 : f32 to vector<64x128xf32>
    %23 = arith.maximumf %21, %22 : vector<64x128xf32>
    %24 = vector.shape_cast %23 : vector<64x128xf32> to vector<8x8x128xf32>
    %cst_18 = arith.constant dense<0xFF800000> : vector<8x128xf32>
    %25 = vector.multi_reduction <maximumf>, %24, %cst_18 [1] : vector<8x8x128xf32> to vector<8x128xf32>
    %26 = arith.truncf %25 : vector<8x128xf32> to vector<8x128xbf16>
    %c0_19 = arith.constant 0 : index
    %c0_20 = arith.constant 0 : index
    %27 = vector.load %arg8[%c0_19, %c0_20] : memref<8x128xbf16, #tpu.memory_space<vmem>>, vector<8x128xbf16>
    tpu.vector_store %arg8[%c0_19, %c0_20], %26 {strides = array<i32>} : memref<8x128xbf16, #tpu.memory_space<vmem>>, vector<8x128xbf16>,
    return
  }
  func.func @transform_0(%arg0: i32) -> (i32, i32) {
    %c0_i32 = arith.constant 0 : i32
    %c0_i32_0 = arith.constant 0 : i32
    return %arg0, %c0_i32 : i32, i32
  }
  func.func @transform_1(%arg0: i32) -> (i32, i32) {
    %c0_i32 = arith.constant 0 : i32
    %c0_i32_0 = arith.constant 0 : i32
    %c0_i32_1 = arith.constant 0 : i32
    return %c0_i32, %c0_i32_0 : i32, i32
  }
  func.func @transform_2(%arg0: i32) -> (i32, i32) {
    %c0_i32 = arith.constant 0 : i32
    %c0_i32_0 = arith.constant 0 : i32
    %c0_i32_1 = arith.constant 0 : i32
    return %c0_i32, %c0_i32_0 : i32, i32
  }
  func.func @transform_3(%arg0: i32) -> (i32, i32) {
    %c0_i32 = arith.constant 0 : i32
    %c0_i32_0 = arith.constant 0 : i32
    %c0_i32_1 = arith.constant 0 : i32
    return %c0_i32, %c0_i32_0 : i32, i32
  }
  func.func @transform_4(%arg0: i32) -> (i32, i32) {
    %c0_i32 = arith.constant 0 : i32
    %c0_i32_0 = arith.constant 0 : i32
    %c0_i32_1 = arith.constant 0 : i32
    return %c0_i32, %c0_i32_0 : i32, i32
  }
  func.func @transform_5(%arg0: i32) -> (i32, i32) {
    %c0_i32 = arith.constant 0 : i32
    %c0_i32_0 = arith.constant 0 : i32
    %c0_i32_1 = arith.constant 0 : i32
    return %c0_i32, %c0_i32_0 : i32, i32
  }
  func.func @transform_6(%arg0: i32) -> (i32, i32) {
    %c0_i32 = arith.constant 0 : i32
    %c0_i32_0 = arith.constant 0 : i32
    %c0_i32_1 = arith.constant 0 : i32
    return %c0_i32, %c0_i32_0 : i32, i32
  }
  func.func @transform_7(%arg0: i32) -> (i32, i32) {
    %c0_i32 = arith.constant 0 : i32
    %c0_i32_0 = arith.constant 0 : i32
    return %arg0, %c0_i32 : i32, i32
  }
}

module attributes {stable_mosaic.version = 11 : i64} {
  func.func @_sa_fused_kernel(%arg0: i32, %arg1: memref<64x131xbf16, #tpu.memory_space<vmem>>, %arg2: memref<131x64xbf16, #tpu.memory_space<vmem>>, %arg3: memref<1x64xf32, #tpu.memory_space<vmem>>, %arg4: memref<64x64xbf16, #tpu.memory_space<vmem>>, %arg5: memref<1x64xf32, #tpu.memory_space<vmem>>, %arg6: memref<64x128xbf16, #tpu.memory_space<vmem>>, %arg7: memref<1x128xf32, #tpu.memory_space<vmem>>, %arg8: memref<8x128xbf16, #tpu.memory_space<vmem>>) attributes {dimension_semantics = [#tpu.dimension_semantics<parallel>], iteration_bounds = array<i64: 1>, scalar_prefetch = 0 : i64, scratch_operands = 0 : i64, tpu.core_type = #tpu.core_type<tc>, window_params = [{transform_indices = @transform_0, window_bounds = array<i64: 64, 131>}, {pipeline_mode = #tpu.pipeline_mode<synchronous>, transform_indices = @transform_1, window_bounds = array<i64: 131, 64>}, {pipeline_mode = #tpu.pipeline_mode<synchronous>, transform_indices = @transform_2, window_bounds = array<i64: 1, 64>}, {pipeline_mode = #tpu.pipeline_mode<synchronous>, transform_indices = @transform_3, window_bounds = array<i64: 64, 64>}, {pipeline_mode = #tpu.pipeline_mode<synchronous>, transform_indices = @transform_4, window_bounds = array<i64: 1, 64>}, {pipeline_mode = #tpu.pipeline_mode<synchronous>, transform_indices = @transform_5, window_bounds = array<i64: 64, 128>}, {pipeline_mode = #tpu.pipeline_mode<synchronous>, transform_indices = @transform_6, window_bounds = array<i64: 1, 128>}, {transform_indices = @transform_7, window_bounds = array<i64: 8, 128>}]} {
    %c0 = arith.constant 0 : index
    %c0_0 = arith.constant 0 : index
    %0 = vector.load %arg1[%c0, %c0_0] : memref<64x131xbf16, #tpu.memory_space<vmem>>, vector<64x131xbf16>
    %c0_1 = arith.constant 0 : index
    %c0_2 = arith.constant 0 : index
    %1 = vector.load %arg2[%c0_1, %c0_2] : memref<131x64xbf16, #tpu.memory_space<vmem>>, vector<131x64xbf16>
    %c0_3 = arith.constant 0 : index
    %c0_4 = arith.constant 0 : index
    %2 = vector.load %arg3[%c0_3, %c0_4] : memref<1x64xf32, #tpu.memory_space<vmem>>, vector<1x64xf32>
    %cst = arith.constant dense<0.000000e+00> : vector<64x64xf32>
    %3 = tpu.matmul %0, %1, %cst {dimension_numbers = #tpu.dot_dimension_numbers<[1], [0], [0], [1], [0, 0, 1, 1], [], []>} : vector<64x131xbf16>, vector<131x64xbf16>, vector<64x64xf32> -> vector<64x64xf32>
    %4 = vector.broadcast %2 : vector<1x64xf32> to vector<64x64xf32>
    %5 = arith.addf %3, %4 : vector<64x64xf32>
    %cst_5 = arith.constant 0.000000e+00 : f32
    %6 = vector.broadcast %cst_5 : f32 to vector<64x64xf32>
    %7 = arith.maximumf %5, %6 : vector<64x64xf32>
    %8 = arith.truncf %7 : vector<64x64xf32> to vector<64x64xbf16>
    %c0_6 = arith.constant 0 : index
    %c0_7 = arith.constant 0 : index
    %9 = vector.load %arg4[%c0_6, %c0_7] : memref<64x64xbf16, #tpu.memory_space<vmem>>, vector<64x64xbf16>
    %c0_8 = arith.constant 0 : index
    %c0_9 = arith.constant 0 : index
    %10 = vector.load %arg5[%c0_8, %c0_9] : memref<1x64xf32, #tpu.memory_space<vmem>>, vector<1x64xf32>
    %cst_10 = arith.constant dense<0.000000e+00> : vector<64x64xf32>
    %11 = tpu.matmul %8, %9, %cst_10 {dimension_numbers = #tpu.dot_dimension_numbers<[1], [0], [0], [1], [0, 0, 1, 1], [], []>} : vector<64x64xbf16>, vector<64x64xbf16>, vector<64x64xf32> -> vector<64x64xf32>
    %12 = vector.broadcast %10 : vector<1x64xf32> to vector<64x64xf32>
    %13 = arith.addf %11, %12 : vector<64x64xf32>
    %cst_11 = arith.constant 0.000000e+00 : f32
    %14 = vector.broadcast %cst_11 : f32 to vector<64x64xf32>
    %15 = arith.maximumf %13, %14 : vector<64x64xf32>
    %16 = arith.truncf %15 : vector<64x64xf32> to vector<64x64xbf16>
    %c0_12 = arith.constant 0 : index
    %c0_13 = arith.constant 0 : index
    %17 = vector.load %arg6[%c0_12, %c0_13] : memref<64x128xbf16, #tpu.memory_space<vmem>>, vector<64x128xbf16>
    %c0_14 = arith.constant 0 : index
    %c0_15 = arith.constant 0 : index
    %18 = vector.load %arg7[%c0_14, %c0_15] : memref<1x128xf32, #tpu.memory_space<vmem>>, vector<1x128xf32>
    %cst_16 = arith.constant dense<0.000000e+00> : vector<64x128xf32>
    %19 = tpu.matmul %16, %17, %cst_16 {dimension_numbers = #tpu.dot_dimension_numbers<[1], [0], [0], [1], [0, 0, 1, 1], [], []>} : vector<64x64xbf16>, vector<64x128xbf16>, vector<64x128xf32> -> vector<64x128xf32>
    %20 = vector.broadcast %18 : vector<1x128xf32> to vector<64x128xf32>
    %21 = arith.addf %19, %20 : vector<64x128xf32>
    %cst_17 = arith.constant 0.000000e+00 : f32
    %22 = vector.broadcast %cst_17 : f32 to vector<64x128xf32>
    %23 = arith.maximumf %21, %22 : vector<64x128xf32>
    %24 = vector.shape_cast %23 : vector<64x128xf32> to vector<8x8x128xf32>
    %cst_18 = arith.constant dense<0xFF800000> : vector<8x128xf32>
    %25 = vector.multi_reduction <maximumf>, %24, %cst_18 [1] : vector<8x8x128xf32> to vector<8x128xf32>
    %26 = arith.truncf %25 : vector<8x128xf32> to vector<8x128xbf16>
    %c0_19 = arith.constant 0 : index
    %c0_20 = arith.constant 0 : index
    %27 = vector.load %arg8[%c0_19, %c0_20] : memref<8x128xbf16, #tpu.memory_space<vmem>>, vector<8x128xbf16>
    tpu.vector_store %arg8[%c0_19, %c0_20], %26 {strides = array<i32>} : memref<8x128xbf16, #tpu.memory_space<vmem>>, vector<8x128xbf16>,
    return
  }
  func.func @transform_0(%arg0: i32) -> (i32, i32) {
    %c0_i32 = arith.constant 0 : i32
    %c0_i32_0 = arith.constant 0 : i32
    return %arg0, %c0_i32 : i32, i32
  }
  func.func @transform_1(%arg0: i32) -> (i32, i32) {
    %c0_i32 = arith.constant 0 : i32
    %c0_i32_0 = arith.constant 0 : i32
    %c0_i32_1 = arith.constant 0 : i32
    return %c0_i32, %c0_i32_0 : i32, i32
  }
  func.func @transform_2(%arg0: i32) -> (i32, i32) {
    %c0_i32 = arith.constant 0 : i32
    %c0_i32_0 = arith.constant 0 : i32
    %c0_i32_1 = arith.constant 0 : i32
    return %c0_i32, %c0_i32_0 : i32, i32
  }
  func.func @transform_3(%arg0: i32) -> (i32, i32) {
    %c0_i32 = arith.constant 0 : i32
    %c0_i32_0 = arith.constant 0 : i32
    %c0_i32_1 = arith.constant 0 : i32
    return %c0_i32, %c0_i32_0 : i32, i32
  }
  func.func @transform_4(%arg0: i32) -> (i32, i32) {
    %c0_i32 = arith.constant 0 : i32
    %c0_i32_0 = arith.constant 0 : i32
    %c0_i32_1 = arith.constant 0 : i32
    return %c0_i32, %c0_i32_0 : i32, i32
  }
  func.func @transform_5(%arg0: i32) -> (i32, i32) {
    %c0_i32 = arith.constant 0 : i32
    %c0_i32_0 = arith.constant 0 : i32
    %c0_i32_1 = arith.constant 0 : i32
    return %c0_i32, %c0_i32_0 : i32, i32
  }
  func.func @transform_6(%arg0: i32) -> (i32, i32) {
    %c0_i32 = arith.constant 0 : i32
    %c0_i32_0 = arith.constant 0 : i32
    %c0_i32_1 = arith.constant 0 : i32
    return %c0_i32, %c0_i32_0 : i32, i32
  }
  func.func @transform_7(%arg0: i32) -> (i32, i32) {
    %c0_i32 = arith.constant 0 : i32
    %c0_i32_0 = arith.constant 0 : i32
    return %arg0, %c0_i32 : i32, i32
  }
}

module attributes {stable_mosaic.version = 11 : i64} {
  func.func @_fc_head_kernel(%arg0: i32, %arg1: memref<2x512xbf16, #tpu.memory_space<vmem>>, %arg2: memref<512x64xbf16, #tpu.memory_space<vmem>>, %arg3: memref<1x64xf32, #tpu.memory_space<vmem>>, %arg4: memref<64x32xbf16, #tpu.memory_space<vmem>>, %arg5: memref<1x32xf32, #tpu.memory_space<vmem>>, %arg6: memref<32x5xbf16, #tpu.memory_space<vmem>>, %arg7: memref<1x5xf32, #tpu.memory_space<vmem>>, %arg8: memref<2x5xf32, #tpu.memory_space<vmem>>) attributes {dimension_semantics = [#tpu.dimension_semantics<arbitrary>], iteration_bounds = array<i64: 1>, scalar_prefetch = 0 : i64, scratch_operands = 0 : i64, tpu.core_type = #tpu.core_type<tc>, window_params = [{pipeline_mode = #tpu.pipeline_mode<synchronous>, transform_indices = @transform_0, window_bounds = array<i64: 2, 512>}, {pipeline_mode = #tpu.pipeline_mode<synchronous>, transform_indices = @transform_1, window_bounds = array<i64: 512, 64>}, {pipeline_mode = #tpu.pipeline_mode<synchronous>, transform_indices = @transform_2, window_bounds = array<i64: 1, 64>}, {pipeline_mode = #tpu.pipeline_mode<synchronous>, transform_indices = @transform_3, window_bounds = array<i64: 64, 32>}, {pipeline_mode = #tpu.pipeline_mode<synchronous>, transform_indices = @transform_4, window_bounds = array<i64: 1, 32>}, {pipeline_mode = #tpu.pipeline_mode<synchronous>, transform_indices = @transform_5, window_bounds = array<i64: 32, 5>}, {pipeline_mode = #tpu.pipeline_mode<synchronous>, transform_indices = @transform_6, window_bounds = array<i64: 1, 5>}, {pipeline_mode = #tpu.pipeline_mode<synchronous>, transform_indices = @transform_7, window_bounds = array<i64: 2, 5>}]} {
    %c0 = arith.constant 0 : index
    %c0_0 = arith.constant 0 : index
    %0 = vector.load %arg1[%c0, %c0_0] : memref<2x512xbf16, #tpu.memory_space<vmem>>, vector<2x512xbf16>
    %c0_1 = arith.constant 0 : index
    %c0_2 = arith.constant 0 : index
    %1 = vector.load %arg2[%c0_1, %c0_2] : memref<512x64xbf16, #tpu.memory_space<vmem>>, vector<512x64xbf16>
    %c0_3 = arith.constant 0 : index
    %c0_4 = arith.constant 0 : index
    %2 = vector.load %arg3[%c0_3, %c0_4] : memref<1x64xf32, #tpu.memory_space<vmem>>, vector<1x64xf32>
    %cst = arith.constant dense<0.000000e+00> : vector<2x64xf32>
    %3 = tpu.matmul %0, %1, %cst {dimension_numbers = #tpu.dot_dimension_numbers<[1], [0], [0], [1], [0, 0, 1, 1], [], []>} : vector<2x512xbf16>, vector<512x64xbf16>, vector<2x64xf32> -> vector<2x64xf32>
    %4 = vector.broadcast %2 : vector<1x64xf32> to vector<2x64xf32>
    %5 = arith.addf %3, %4 : vector<2x64xf32>
    %cst_5 = arith.constant 0.000000e+00 : f32
    %6 = vector.broadcast %cst_5 : f32 to vector<2x64xf32>
    %7 = arith.maximumf %5, %6 : vector<2x64xf32>
    %8 = arith.truncf %7 : vector<2x64xf32> to vector<2x64xbf16>
    %c0_6 = arith.constant 0 : index
    %c0_7 = arith.constant 0 : index
    %9 = vector.load %arg4[%c0_6, %c0_7] : memref<64x32xbf16, #tpu.memory_space<vmem>>, vector<64x32xbf16>
    %c0_8 = arith.constant 0 : index
    %c0_9 = arith.constant 0 : index
    %10 = vector.load %arg5[%c0_8, %c0_9] : memref<1x32xf32, #tpu.memory_space<vmem>>, vector<1x32xf32>
    %cst_10 = arith.constant dense<0.000000e+00> : vector<2x32xf32>
    %11 = tpu.matmul %8, %9, %cst_10 {dimension_numbers = #tpu.dot_dimension_numbers<[1], [0], [0], [1], [0, 0, 1, 1], [], []>} : vector<2x64xbf16>, vector<64x32xbf16>, vector<2x32xf32> -> vector<2x32xf32>
    %12 = vector.broadcast %10 : vector<1x32xf32> to vector<2x32xf32>
    %13 = arith.addf %11, %12 : vector<2x32xf32>
    %cst_11 = arith.constant 0.000000e+00 : f32
    %14 = vector.broadcast %cst_11 : f32 to vector<2x32xf32>
    %15 = arith.maximumf %13, %14 : vector<2x32xf32>
    %16 = arith.truncf %15 : vector<2x32xf32> to vector<2x32xbf16>
    %c0_12 = arith.constant 0 : index
    %c0_13 = arith.constant 0 : index
    %17 = vector.load %arg6[%c0_12, %c0_13] : memref<32x5xbf16, #tpu.memory_space<vmem>>, vector<32x5xbf16>
    %c0_14 = arith.constant 0 : index
    %c0_15 = arith.constant 0 : index
    %18 = vector.load %arg7[%c0_14, %c0_15] : memref<1x5xf32, #tpu.memory_space<vmem>>, vector<1x5xf32>
    %cst_16 = arith.constant dense<0.000000e+00> : vector<2x5xf32>
    %19 = tpu.matmul %16, %17, %cst_16 {dimension_numbers = #tpu.dot_dimension_numbers<[1], [0], [0], [1], [0, 0, 1, 1], [], []>} : vector<2x32xbf16>, vector<32x5xbf16>, vector<2x5xf32> -> vector<2x5xf32>
    %20 = vector.broadcast %18 : vector<1x5xf32> to vector<2x5xf32>
    %21 = arith.addf %19, %20 : vector<2x5xf32>
    %c0_17 = arith.constant 0 : index
    %c0_18 = arith.constant 0 : index
    %22 = vector.load %arg8[%c0_17, %c0_18] : memref<2x5xf32, #tpu.memory_space<vmem>>, vector<2x5xf32>
    tpu.vector_store %arg8[%c0_17, %c0_18], %21 {strides = array<i32>} : memref<2x5xf32, #tpu.memory_space<vmem>>, vector<2x5xf32>,
    return
  }
  func.func @transform_0(%arg0: i32) -> (i32, i32) {
    %c0_i32 = arith.constant 0 : i32
    %c0_i32_0 = arith.constant 0 : i32
    %c0_i32_1 = arith.constant 0 : i32
    return %c0_i32, %c0_i32_0 : i32, i32
  }
  func.func @transform_1(%arg0: i32) -> (i32, i32) {
    %c0_i32 = arith.constant 0 : i32
    %c0_i32_0 = arith.constant 0 : i32
    %c0_i32_1 = arith.constant 0 : i32
    return %c0_i32, %c0_i32_0 : i32, i32
  }
  func.func @transform_2(%arg0: i32) -> (i32, i32) {
    %c0_i32 = arith.constant 0 : i32
    %c0_i32_0 = arith.constant 0 : i32
    %c0_i32_1 = arith.constant 0 : i32
    return %c0_i32, %c0_i32_0 : i32, i32
  }
  func.func @transform_3(%arg0: i32) -> (i32, i32) {
    %c0_i32 = arith.constant 0 : i32
    %c0_i32_0 = arith.constant 0 : i32
    %c0_i32_1 = arith.constant 0 : i32
    return %c0_i32, %c0_i32_0 : i32, i32
  }
  func.func @transform_4(%arg0: i32) -> (i32, i32) {
    %c0_i32 = arith.constant 0 : i32
    %c0_i32_0 = arith.constant 0 : i32
    %c0_i32_1 = arith.constant 0 : i32
    return %c0_i32, %c0_i32_0 : i32, i32
  }
  func.func @transform_5(%arg0: i32) -> (i32, i32) {
    %c0_i32 = arith.constant 0 : i32
    %c0_i32_0 = arith.constant 0 : i32
    %c0_i32_1 = arith.constant 0 : i32
    return %c0_i32, %c0_i32_0 : i32, i32
  }
  func.func @transform_6(%arg0: i32) -> (i32, i32) {
    %c0_i32 = arith.constant 0 : i32
    %c0_i32_0 = arith.constant 0 : i32
    %c0_i32_1 = arith.constant 0 : i32
    return %c0_i32, %c0_i32_0 : i32, i32
  }
  func.func @transform_7(%arg0: i32) -> (i32, i32) {
    %c0_i32 = arith.constant 0 : i32
    %c0_i32_0 = arith.constant 0 : i32
    %c0_i32_1 = arith.constant 0 : i32
    return %c0_i32, %c0_i32_0 : i32, i32
  }
}

</mosaic_0001>

<bundles_post_ra>
// kernel: custom-call.22
= control target key start
LH: loop header
LB: loop body
LE: loop exit
PB: predicated region body
PF: predicated region fallthrough
CT: control target
= control target key end

     0   :  { %s6_s0 = inlined_call_operand.vmem [shape: f32[2,64], index: 0, kind: output, shape index: {}]  }

// kernel: custom-call.23
= control target key start
LH: loop header
LB: loop body
LE: loop exit
PB: predicated region body
PF: predicated region fallthrough
CT: control target
= control target key end

     0   :  { %s6_s0 = inlined_call_operand.vmem [shape: f32[2,16], index: 0, kind: output, shape index: {}]  }

// kernel: pointnet_plus_cls_forward.4
= control target key start
LH: loop header
LB: loop body
LE: loop exit
PB: predicated region body
PF: predicated region fallthrough
CT: control target
= control target key end

     0   :  { %s1303_s24 = smov 0   ;;  %s1411_s0 = inlined_call_operand.vmem [shape: bf16[256,3], index: 0, kind: input, shape index: {}]   ;;  %s1412_s1 = inlined_call_operand.vmem [shape: bf16[3,16], index: 1, kind: input, shape index: {}]   ;;  %s1413_s2 = inlined_call_operand.vmem [shape: f32[1,16], index: 2, kind: input, shape index: {}]   ;;  %s1414_s3 = inlined_call_operand.vmem [shape: bf16[16,16], index: 3, kind: input, shape index: {}]   ;;  %s1415_s4 = inlined_call_operand.vmem [shape: f32[1,16], index: 4, kind: input, shape index: {}]   ;;  %s1416_s5 = inlined_call_operand.vmem [shape: bf16[16,128], index: 5, kind: input, shape index: {}]   ;;  %s1417_s6 = inlined_call_operand.vmem [shape: f32[1,128], index: 6, kind: input, shape index: {}]   ;;  %s1418_s7 = inlined_call_operand.vmem [shape: bf16[32,128], index: 7, kind: output, shape index: {}]  }
   0x1 LB: > { %s1072_s25 = sadd.s32 4294967295, %s1260_s24   ;;  %p1076_p0 = scmp.ge.s32.totalorder %s1260_s24, 1  ;;  %s1260_s24 = sphi %s1303_s24, %s17_s24  }
   0x2   : > { %p238_p1 = scmp.lt.s32.totalorder %s1260_s24, 3 }
   0x4   : > { %p239_p2 = pnand %p1076_p0, %p238_p1 }
   0x5   : > { %v299_v0 = vld [vmem:[%s1412_s1] sm:$0x3] (!%p239_p2)  ;;  %vm372_vm0 = vcmask (!%p239_p2), 1040384   ;;  %vm373_vm1 = vcmask (!%p239_p2), 1041408   ;;  %s1077_s28 = sshll.u32 (!%p239_p2), %s1072_s25, 4  ;;  %v1262_v1 = vmov (!%p239_p2), 65535  }
   0x6   : > { %242 = sbr.rel (%p239_p2) target bundleno = 735 (0x2df), region = 48  ;;  %v374_v2 = vsel (!%p239_p2), %vm372_vm0, 4294967295, %v1262_v1  ;;  %p271_p3 = scmp.lt.s32.totalorder (!%p239_p2), %s1077_s28, 31  ;;  %v1252_v5 = vld [vmem:[%s1414_s3] sm:$0xff] (!%p239_p2)   ;;  %vm347_vm2 = vcmask (!%p239_p2), 23552   ;;  %vm515_vm3 = vcmask (!%p239_p2), 130048  }
   0x7   : > { %v375_v3 = vsel (!%p239_p2), %vm373_vm1, %v374_v2, 0  ;;  %v1253_v14 = vld [vmem:[%s1416_s5] sm:$0xff] (!%p239_p2)   ;;  %vm989_vm4 = vcmask (!%p239_p2), 1041409   ;;  %vm991_vm5 = vcmask (!%p239_p2), 1042434   ;;  %vm993_vm6 = vcmask (!%p239_p2), 1043459   ;;  %s1370_s20 = sshll.u32 (!%p239_p2), %s1072_s25, 1 }
   0x8   : > { %v377_v4 = vand.u32 (!%p239_p2), %v375_v3, %v299_v0  ;;  %v1081_v15 = vld [vmem:[%s1413_s2] ss:$0 sm:$0xff] (!%p239_p2)  ;;  %vm995_vm7 = vcmask (!%p239_p2), 1044484   ;;  %vm997_vm8 = vcmask (!%p239_p2), 1045509   ;;  %vm999_vm9 = vcmask (!%p239_p2), 1046534   ;;  %p277_p4 = scmp.lt.s32.totalorder (!%p239_p2), %s1370_s20, 3 }
   0x9   : > { %vm1001_vm10 = vcmask (!%p239_p2), 1047559  }
   0xa   : > { %1179 = vmatprep.subr.bf16.mxu0 (!%p239_p2), %v377_v4  ;;  %1233 = vmatprep.subr.bf16.mxu1 (!%p239_p2), %v377_v4 }
   0xb   : > { %1180 = vmatpush3.bf16.msra.mxu0 (!%p239_p2), %v377_v4  ;;  %1234 = vmatpush3.bf16.msra.mxu1 (!%p239_p2), %v377_v4 }
   0xc   : > { %1197 = vmatprep.subr.bf16.mxu1 (!%p239_p2), %v1252_v5  ;;  %1215 = vmatprep.subr.bf16.mxu0 (!%p239_p2), %v1253_v14 }
   0xd   : > { %s1420_s28 = smov (!%p271_p3, %s1077_s28), 31  ;;  %s1422_s20 = smov (!%p277_p4, %s1370_s20), 3 }
   0xe   : > { %s1078_s8 = sshll.u32 %s1420_s28, 2  ;;  %s1080_s21 = sshll.u32 %s1422_s20, 2 }
   0xf   : > { %s274_s11 = scalar_lea.vmem %s1411_s0, %s1078_s8  ;;  %s1395_s25 = scalar_lea.vmem %s1418_s7, %s1080_s21 }
  0x10   : > { %v1244_v6 = vld [vmem:[%s274_s11] sm:$0xff]   ;;  %v1245_v7 = vld [vmem:[%s274_s11 + $0x8] sm:$0xff]   ;;  %v1246_v8 = vld [vmem:[%s274_s11 + $0x10] sm:$0xff]  }
  0x11   : > { %1181 = vmatprep.mubr.msk.bf16.mxu0 %vm347_vm2, %v1244_v6  ;;  %v1248_v9 = vld [vmem:[%s274_s11 + $0x20] sm:$0xff]   ;;  %v1249_v10 = vld [vmem:[%s274_s11 + $0x28] sm:$0xff]   ;;  %v1250_v11 = vld [vmem:[%s274_s11 + $0x30] sm:$0xff]  }
  0x12   : > { %1182 = vmatmul.mubr.msk.bf16.vlgmr.msra.gmra.mrb[0].mxu0 %vm347_vm2, %v1245_v7  ;;  %1189 = vmatprep.mubr.msk.bf16.mxu1 %vm347_vm2, %v1248_v9  ;;  %v1247_v12 = vld [vmem:[%s274_s11 + $0x18] sm:$0xff]  }
  0x13   : > { %1185 = vmatprep.mubr.msk.bf16.mxu0 %vm347_vm2, %v1246_v8  ;;  %1190 = vmatmul.mubr.msk.bf16.vlgmr.msra.gmra.mrb[0].mxu1 %vm347_vm2, %v1249_v10  ;;  %v1251_v13 = vld [vmem:[%s274_s11 + $0x38] sm:$0xff]   ;;  %v1098_v8 = vld [vmem:[%s1415_s4] ss:$0 sm:$0xff] }
  0x14   : > { %1193 = vmatprep.mubr.msk.bf16.mxu1 %vm347_vm2, %v1250_v11  ;;  %1198 = vmatpush3.bf16.msra.mxu1 %v1252_v5 }
  0x15   : > { %1216 = vmatpush3.bf16.msra.mxu0 %v1253_v14 }
  0x1a   : > { %1186 = vmatmul.mubr.msk.bf16.gmra.mrb[4].mxu0 %vm347_vm2, %v1247_v12 }
  0x1b   : > { %1194 = vmatmul.mubr.msk.bf16.gmra.mrb[4].mxu1 %vm347_vm2, %v1251_v13 }
  0xe5   : > { %v1183_v16 = vpop.f32.mrb[0].mxu0 }
  0xe6   : > { %v422_v17 = vadd.f32 %v1183_v16, %v1081_v15  ;;  %v413_v18 = vpop.f32.mrb[1].mxu0  ;;  %v1191_v24 = vpop.f32.mrb[0].mxu1 }
  0xe7   : > { %v414_v19 = vadd.f32 %v1081_v15, %v413_v18  ;;  %v1184_v20 = vpop.f32.mrb[2].mxu0  ;;  %v454_v27 = vadd.f32 %v1191_v24, %v1081_v15  ;;  %v445_v28 = vpop.f32.mrb[1].mxu1 }
  0xe8   : > { %v425_v21 = vadd.f32 %v1184_v20, %v1081_v15  ;;  %v416_v22 = vpop.f32.mrb[3].mxu0  ;;  %v478_v25 = vmax.f32 %v422_v17, 0.0  ;;  %v446_v31 = vadd.f32 %v1081_v15, %v445_v28  ;;  %v1192_v32 = vpop.f32.mrb[2].mxu1 }
  0xe9   : > { %v417_v23 = vadd.f32 %v1081_v15, %v416_v22  ;;  %v476_v29 = vmax.f32 %v414_v19, 0.0  ;;  %v486_v34 = vmax.f32 %v454_v27, 0.0  ;;  %v457_v35 = vadd.f32 %v1192_v32, %v1081_v15  ;;  %v448_v36 = vpop.f32.mrb[3].mxu1 }
  0xea   : > { %v479_v26 = vmax.f32 %v425_v21, 0.0  ;;  %v484_v39 = vmax.f32 %v446_v31, 0.0  ;;  %v449_v40 = vadd.f32 %v1081_v15, %v448_v36 }
  0xeb   : > { %v477_v30 = vmax.f32 %v417_v23, 0.0  ;;  %v487_v43 = vmax.f32 %v457_v35, 0.0 }
  0xec   : > { %v493_v33 = vpack.c.bf16 %v479_v26, %v478_v25  ;;  %v485_v46 = vmax.f32 %v449_v40, 0.0 }
  0xed   : > { %v492_v37 = vpack.c.bf16 %v477_v30, %v476_v29  ;;  %v1187_v38 = vpop.f32.mrb[4].mxu0  ;;  %v497_v49 = vpack.c.bf16 %v487_v43, %v486_v34 }
  0xee   : > { %v438_v41 = vadd.f32 %v1187_v38, %v1081_v15  ;;  %v429_v42 = vpop.f32.mrb[5].mxu0  ;;  %v496_v51 = vpack.c.bf16 %v485_v46, %v484_v39  ;;  %v1195_v52 = vpop.f32.mrb[4].mxu1 }
  0xef   : > { %v430_v44 = vadd.f32 %v1081_v15, %v429_v42  ;;  %v1188_v45 = vpop.f32.mrb[6].mxu0  ;;  %1199 = vmatprep.mubr.msk.bf16.mxu1 %vm515_vm3, %v492_v37  ;;  %v470_v55 = vadd.f32 %v1195_v52, %v1081_v15  ;;  %v461_v56 = vpop.f32.mrb[5].mxu1 }
  0xf0   : > { %v441_v47 = vadd.f32 %v1188_v45, %v1081_v15  ;;  %v432_v48 = vpop.f32.mrb[7].mxu0  ;;  %1200 = vmatmul.mubr.msk.bf16.vlgmr.msra.gmra.mrb[8].mxu1 %vm515_vm3, %v493_v33  ;;  %v482_v53 = vmax.f32 %v438_v41, 0.0  ;;  %v462_v59 = vadd.f32 %v1081_v15, %v461_v56  ;;  %v1196_v60 = vpop.f32.mrb[6].mxu1 }
  0xf1   : > { %v433_v50 = vadd.f32 %v1081_v15, %v432_v48  ;;  %v480_v57 = vmax.f32 %v430_v44, 0.0  ;;  %v490_v62 = vmax.f32 %v470_v55, 0.0  ;;  %v473_v63 = vadd.f32 %v1196_v60, %v1081_v15  ;;  %v464_v0 = vpop.f32.mrb[7].mxu1 }
  0xf2   : > { %v483_v54 = vmax.f32 %v441_v47, 0.0  ;;  %v488_v2 = vmax.f32 %v462_v59, 0.0  ;;  %v465_v3 = vadd.f32 %v1081_v15, %v464_v0 }
  0xf3   : > { %v481_v58 = vmax.f32 %v433_v50, 0.0  ;;  %v491_v4 = vmax.f32 %v473_v63, 0.0 }
  0xf4   : > { %v495_v61 = vpack.c.bf16 %v483_v54, %v482_v53  ;;  %v489_v5 = vmax.f32 %v465_v3, 0.0 }
  0xf5   : > { %v494_v1 = vpack.c.bf16 %v481_v58, %v480_v57  ;;  %v499_v6 = vpack.c.bf16 %v491_v4, %v490_v62 }
  0xf6   : > { %v498_v7 = vpack.c.bf16 %v489_v5, %v488_v2 }
  0xf7   : > { %1203 = vmatprep.mubr.msk.bf16.mxu1 %vm515_vm3, %v494_v1  ;;  %v1358_v1 = vld [vmem:[%s1417_s6] ss:$0 sm:$0xff] }
  0xf8   : > { %1204 = vmatmul.mubr.msk.bf16.gmra.mrb[12].mxu1 %vm515_vm3, %v495_v61 }
  0xf9   : > { %1207 = vmatprep.mubr.msk.bf16.mxu1 %vm515_vm3, %v496_v51 }
 0x100   : > { %1208 = vmatmul.mubr.msk.bf16.gmra.mrb[16].mxu1 %vm515_vm3, %v497_v49 }
 0x101   : > { %1211 = vmatprep.mubr.msk.bf16.mxu1 %vm515_vm3, %v498_v7 }
 0x108   : > { %1212 = vmatmul.mubr.msk.bf16.gmra.mrb[20].mxu1 %vm515_vm3, %v499_v6 }
 0x1c3   : > { %v1201_v9 = vpop.f32.mrb[8].mxu1 }
 0x1c4   : > { %v583_v10 = vadd.f32 %v1201_v9, %v1098_v8  ;;  %v574_v11 = vpop.f32.mrb[9].mxu1 }
 0x1c5   : > { %v575_v12 = vadd.f32 %v1098_v8, %v574_v11  ;;  %v1202_v13 = vpop.f32.mrb[10].mxu1 }
 0x1c6   : > { %v586_v14 = vadd.f32 %v1202_v13, %v1098_v8  ;;  %v577_v15 = vpop.f32.mrb[11].mxu1  ;;  %v639_v17 = vmax.f32 %v583_v10, 0.0 }
 0x1c7   : > { %v578_v16 = vadd.f32 %v1098_v8, %v577_v15  ;;  %v637_v19 = vmax.f32 %v575_v12, 0.0 }
 0x1c8   : > { %v640_v18 = vmax.f32 %v586_v14, 0.0 }
 0x1c9   : > { %v638_v20 = vmax.f32 %v578_v16, 0.0 }
 0x1ca   : > { %v654_v21 = vpack.c.bf16 %v640_v18, %v639_v17 }
 0x1cb   : > { %v653_v22 = vpack.c.bf16 %v638_v20, %v637_v19  ;;  %v1205_v23 = vpop.f32.mrb[12].mxu1 }
 0x1cc   : > { %v599_v24 = vadd.f32 %v1205_v23, %v1098_v8  ;;  %v590_v25 = vpop.f32.mrb[13].mxu1 }
 0x1cd   : > { %v591_v26 = vadd.f32 %v1098_v8, %v590_v25  ;;  %v1206_v27 = vpop.f32.mrb[14].mxu1  ;;  %1217 = vmatprep.mubr.msk.bf16.mxu0 %vm515_vm3, %v653_v22 }
 0x1ce   : > { %v602_v28 = vadd.f32 %v1206_v27, %v1098_v8  ;;  %v593_v29 = vpop.f32.mrb[15].mxu1  ;;  %1218 = vmatmul.mubr.msk.bf16.vlgmr.msra.gmra.mrb[8].mxu0 %vm515_vm3, %v654_v21  ;;  %v643_v31 = vmax.f32 %v599_v24, 0.0 }
 0x1cf   : > { %v594_v30 = vadd.f32 %v1098_v8, %v593_v29  ;;  %v641_v33 = vmax.f32 %v591_v26, 0.0 }
 0x1d0   : > { %v644_v32 = vmax.f32 %v602_v28, 0.0 }
 0x1d1   : > { %v642_v34 = vmax.f32 %v594_v30, 0.0 }
 0x1d2   : > { %v656_v35 = vpack.c.bf16 %v644_v32, %v643_v31 }
 0x1d3   : > { %v655_v36 = vpack.c.bf16 %v642_v34, %v641_v33  ;;  %v1209_v37 = vpop.f32.mrb[16].mxu1 }
 0x1d4   : > { %v615_v38 = vadd.f32 %v1209_v37, %v1098_v8  ;;  %v606_v39 = vpop.f32.mrb[17].mxu1 }
 0x1d5   : > { %v607_v40 = vadd.f32 %v1098_v8, %v606_v39  ;;  %v1210_v41 = vpop.f32.mrb[18].mxu1  ;;  %1221 = vmatprep.mubr.msk.bf16.mxu0 %vm515_vm3, %v655_v36 }
 0x1d6   : > { %v618_v42 = vadd.f32 %v1210_v41, %v1098_v8  ;;  %v609_v43 = vpop.f32.mrb[19].mxu1  ;;  %1222 = vmatmul.mubr.msk.bf16.gmra.mrb[12].mxu0 %vm515_vm3, %v656_v35  ;;  %v647_v45 = vmax.f32 %v615_v38, 0.0 }
 0x1d7   : > { %v610_v44 = vadd.f32 %v1098_v8, %v609_v43  ;;  %v645_v47 = vmax.f32 %v607_v40, 0.0 }
 0x1d8   : > { %v648_v46 = vmax.f32 %v618_v42, 0.0 }
 0x1d9   : > { %v646_v48 = vmax.f32 %v610_v44, 0.0 }
 0x1da   : > { %v658_v49 = vpack.c.bf16 %v648_v46, %v647_v45 }
 0x1db   : > { %v657_v50 = vpack.c.bf16 %v646_v48, %v645_v47  ;;  %v1213_v51 = vpop.f32.mrb[20].mxu1 }
 0x1dc   : > { %v631_v52 = vadd.f32 %v1213_v51, %v1098_v8  ;;  %v622_v53 = vpop.f32.mrb[21].mxu1 }
 0x1dd   : > { %v623_v54 = vadd.f32 %v1098_v8, %v622_v53  ;;  %v1214_v55 = vpop.f32.mrb[22].mxu1  ;;  %1225 = vmatprep.mubr.msk.bf16.mxu0 %vm515_vm3, %v657_v50 }
 0x1de   : > { %v634_v56 = vadd.f32 %v1214_v55, %v1098_v8  ;;  %v625_v57 = vpop.f32.mrb[23].mxu1  ;;  %1226 = vmatmul.mubr.msk.bf16.gmra.mrb[16].mxu0 %vm515_vm3, %v658_v49  ;;  %v651_v59 = vmax.f32 %v631_v52, 0.0 }
 0x1df   : > { %v626_v58 = vadd.f32 %v1098_v8, %v625_v57  ;;  %v649_v61 = vmax.f32 %v623_v54, 0.0 }
 0x1e0   : > { %v652_v60 = vmax.f32 %v634_v56, 0.0 }
 0x1e1   : > { %v650_v62 = vmax.f32 %v626_v58, 0.0 }
 0x1e2   : > { %v660_v63 = vpack.c.bf16 %v652_v60, %v651_v59 }
 0x1e3   : > { %v659_v0 = vpack.c.bf16 %v650_v62, %v649_v61 }
 0x1e5   : > { %1229 = vmatprep.mubr.msk.bf16.mxu0 %vm515_vm3, %v659_v0 }
 0x1e6   : > { %1230 = vmatmul.mubr.msk.bf16.gmra.mrb[20].mxu0 %vm515_vm3, %v660_v63 }
 0x2a1   : > { %v1219_v2 = vpop.f32.mrb[8].mxu0 }
 0x2a2   : > { %v743_v3 = vadd.f32 %v1219_v2, %v1358_v1  ;;  %v734_v4 = vpop.f32.mrb[9].mxu0 }
 0x2a3   : > { %v735_v5 = vadd.f32 %v1358_v1, %v734_v4  ;;  %v1220_v6 = vpop.f32.mrb[10].mxu0 }
 0x2a4   : > { %v799_v7 = vmax.f32 %v743_v3, 0.0  ;;  %v746_v8 = vadd.f32 %v1220_v6, %v1358_v1  ;;  %v737_v9 = vpop.f32.mrb[11].mxu0 }
 0x2a5   : > { %v797_v10 = vmax.f32 %v735_v5, 0.0  ;;  %v738_v11 = vadd.f32 %v1358_v1, %v737_v9 }
 0x2a6   : > { %v825_v12 = vrot.slane %v799_v7, 4  ;;  %v800_v13 = vmax.f32 %v746_v8, 0.0 }
 0x2a7   : > { %v813_v14 = vrot.slane %v797_v10, 4  ;;  %v798_v15 = vmax.f32 %v738_v11, 0.0 }
 0x2a8   : > { %v826_v16 = vmax.f32 %v799_v7, %v825_v12  ;;  %v831_v17 = vrot.slane %v800_v13, 4 }
 0x2a9   : > { %v814_v18 = vmax.f32 %v797_v10, %v813_v14  ;;  %v819_v19 = vrot.slane %v798_v15, 4  ;;  %v1223_v20 = vpop.f32.mrb[12].mxu0 }
 0x2aa   : > { %v827_v21 = vrot.slane %v826_v16, 2  ;;  %v832_v22 = vmax.f32 %v800_v13, %v831_v17  ;;  %v759_v23 = vadd.f32 %v1223_v20, %v1358_v1  ;;  %v750_v24 = vpop.f32.mrb[13].mxu0 }
 0x2ab   : > { %v815_v25 = vrot.slane %v814_v18, 2  ;;  %v820_v26 = vmax.f32 %v798_v15, %v819_v19  ;;  %v751_v27 = vadd.f32 %v1358_v1, %v750_v24  ;;  %v1224_v28 = vpop.f32.mrb[14].mxu0 }
 0x2ac   : > { %v828_v29 = vmax.f32 %v826_v16, %v827_v21  ;;  %v833_v30 = vrot.slane %v832_v22, 2  ;;  %v803_v31 = vmax.f32 %v759_v23, 0.0  ;;  %v762_v32 = vadd.f32 %v1224_v28, %v1358_v1  ;;  %v753_v33 = vpop.f32.mrb[15].mxu0 }
 0x2ad   : > { %v816_v34 = vmax.f32 %v814_v18, %v815_v25  ;;  %v821_v35 = vrot.slane %v820_v26, 2  ;;  %v801_v36 = vmax.f32 %v751_v27, 0.0  ;;  %v754_v37 = vadd.f32 %v1358_v1, %v753_v33 }
 0x2ae   : > { %v829_v38 = vrot.slane %v828_v29, 1  ;;  %v834_v39 = vmax.f32 %v832_v22, %v833_v30  ;;  %v849_v40 = vrot.slane %v803_v31, 4  ;;  %v804_v41 = vmax.f32 %v762_v32, 0.0 }
 0x2af   : > { %v817_v42 = vrot.slane %v816_v34, 1  ;;  %v822_v43 = vmax.f32 %v820_v26, %v821_v35  ;;  %v837_v44 = vrot.slane %v801_v36, 4  ;;  %v802_v45 = vmax.f32 %v754_v37, 0.0 }
 0x2b0   : > { %v830_v46 = vmax.f32 %v828_v29, %v829_v38  ;;  %v835_v47 = vrot.slane %v834_v39, 1  ;;  %v850_v48 = vmax.f32 %v803_v31, %v849_v40  ;;  %v855_v49 = vrot.slane %v804_v41, 4 }
 0x2b1   : > { %v818_v50 = vmax.f32 %v816_v34, %v817_v42  ;;  %v823_v51 = vrot.slane %v822_v43, 1  ;;  %v838_v52 = vmax.f32 %v801_v36, %v837_v44  ;;  %v843_v53 = vrot.slane %v802_v45, 4  ;;  %v1227_v54 = vpop.f32.mrb[16].mxu0 }
 0x2b2   : > { %v1138_v55 = vpack.c.bf16 %v830_v46, %v830_v46  ;;  %v836_v56 = vmax.f32 %v834_v39, %v835_v47  ;;  %v851_v57 = vrot.slane %v850_v48, 2  ;;  %v856_v58 = vmax.f32 %v804_v41, %v855_v49  ;;  %v766_v59 = vpop.f32.mrb[17].mxu0 }
 0x2b3   : > { %v1136_v60 = vpack.c.bf16 %v818_v50, %v818_v50  ;;  %v824_v61 = vmax.f32 %v822_v43, %v823_v51  ;;  %v839_v62 = vrot.slane %v838_v52, 2  ;;  %v844_v63 = vmax.f32 %v802_v45, %v843_v53  ;;  %v1228_v0 = vpop.f32.mrb[18].mxu0 }
 0x2b4   : > { %v975_v2 = vunpack.c.l.b16 %v1138_v55  ;;  %v1139_v3 = vpack.c.bf16 %v836_v56, %v836_v56  ;;  %v852_v4 = vmax.f32 %v850_v48, %v851_v57  ;;  %v857_v5 = vrot.slane %v856_v58, 2  ;;  %v769_v6 = vpop.f32.mrb[19].mxu0 }
 0x2b5   : > { %v973_v7 = vunpack.c.l.b16 %v1136_v60  ;;  %v1137_v8 = vpack.c.bf16 %v824_v61, %v824_v61  ;;  %v840_v9 = vmax.f32 %v838_v52, %v839_v62  ;;  %v845_v10 = vrot.slane %v844_v63, 2 }
 0x2b6   : > { %v976_v11 = vunpack.c.l.b16 %v1139_v3  ;;  %v853_v12 = vrot.slane %v852_v4, 1  ;;  %v858_v13 = vmax.f32 %v856_v58, %v857_v5  ;;  %v775_v14 = vadd.f32 %v1227_v54, %v1358_v1 }
 0x2b7   : > { %v974_v15 = vunpack.c.l.b16 %v1137_v8  ;;  %v841_v16 = vrot.slane %v840_v9, 1  ;;  %v846_v17 = vmax.f32 %v844_v63, %v845_v10  ;;  %v767_v18 = vadd.f32 %v1358_v1, %v766_v59 }
 0x2b8   : > { %v854_v19 = vmax.f32 %v852_v4, %v853_v12  ;;  %v859_v20 = vrot.slane %v858_v13, 1  ;;  %v807_v21 = vmax.f32 %v775_v14, 0.0  ;;  %v778_v22 = vadd.f32 %v1228_v0, %v1358_v1 }
 0x2b9   : > { %v990_v23 = vsel %vm989_vm4, %v974_v15, %v973_v7  ;;  %v842_v24 = vmax.f32 %v840_v9, %v841_v16  ;;  %v847_v25 = vrot.slane %v846_v17, 1  ;;  %v805_v26 = vmax.f32 %v767_v18, 0.0  ;;  %v1231_v27 = vpop.f32.mrb[20].mxu0 }
 0x2ba   : > { %v992_v28 = vsel %vm991_vm5, %v975_v2, %v990_v23  ;;  %v1142_v29 = vpack.c.bf16 %v854_v19, %v854_v19  ;;  %v860_v30 = vmax.f32 %v858_v13, %v859_v20  ;;  %v873_v31 = vrot.slane %v807_v21, 4  ;;  %v782_v32 = vpop.f32.mrb[21].mxu0 }
 0x2bb   : > { %v1140_v33 = vpack.c.bf16 %v842_v24, %v842_v24  ;;  %v994_v34 = vsel %vm993_vm6, %v976_v11, %v992_v28  ;;  %v848_v35 = vmax.f32 %v846_v17, %v847_v25  ;;  %v861_v36 = vrot.slane %v805_v26, 4  ;;  %v1232_v37 = vpop.f32.mrb[22].mxu0 }
 0x2bc   : > { %v979_v38 = vunpack.c.l.b16 %v1142_v29  ;;  %v1143_v39 = vpack.c.bf16 %v860_v30, %v860_v30  ;;  %v874_v40 = vmax.f32 %v807_v21, %v873_v31  ;;  %v808_v41 = vmax.f32 %v778_v22, 0.0  ;;  %v785_v42 = vpop.f32.mrb[23].mxu0 }
 0x2bd   : > { %v977_v43 = vunpack.c.l.b16 %v1140_v33  ;;  %v1141_v44 = vpack.c.bf16 %v848_v35, %v848_v35  ;;  %v862_v45 = vmax.f32 %v805_v26, %v861_v36  ;;  %v770_v46 = vadd.f32 %v1358_v1, %v769_v6 }
 0x2be   : > { %v980_v47 = vunpack.c.l.b16 %v1143_v39  ;;  %v875_v48 = vrot.slane %v874_v40, 2  ;;  %v879_v49 = vrot.slane %v808_v41, 4  ;;  %v791_v50 = vadd.f32 %v1231_v27, %v1358_v1 }
 0x2bf   : > { %v996_v51 = vsel %vm995_vm7, %v977_v43, %v994_v34  ;;  %v978_v52 = vunpack.c.l.b16 %v1141_v44  ;;  %v863_v53 = vrot.slane %v862_v45, 2  ;;  %v806_v54 = vmax.f32 %v770_v46, 0.0 }
 0x2c0   : > { %v876_v55 = vmax.f32 %v874_v40, %v875_v48  ;;  %v880_v56 = vmax.f32 %v808_v41, %v879_v49  ;;  %v811_v57 = vmax.f32 %v791_v50, 0.0  ;;  %v783_v58 = vadd.f32 %v1358_v1, %v782_v32 }
 0x2c1   : > { %v998_v59 = vsel %vm997_vm8, %v978_v52, %v996_v51  ;;  %v864_v60 = vmax.f32 %v862_v45, %v863_v53  ;;  %v867_v61 = vrot.slane %v806_v54, 4  ;;  %v794_v62 = vadd.f32 %v1232_v37, %v1358_v1 }
 0x2c2   : > { %v1000_v63 = vsel %vm999_vm9, %v979_v38, %v998_v59  ;;  %v881_v0 = vrot.slane %v880_v56, 2  ;;  %v897_v2 = vrot.slane %v811_v57, 4  ;;  %v809_v6 = vmax.f32 %v783_v58, 0.0 }
 0x2c3   : > { %v1002_v3 = vsel %vm1001_vm10, %v980_v47, %v1000_v63  ;;  %v865_v4 = vrot.slane %v864_v60, 1  ;;  %v868_v5 = vmax.f32 %v806_v54, %v867_v61  ;;  %v877_v8 = vrot.slane %v876_v55, 1 }
 0x2c4   : > { %v1010_v7 = vpack.c.b16 %v1002_v3, %v1002_v3  ;;  %v882_v9 = vmax.f32 %v880_v56, %v881_v0  ;;  %v898_v10 = vmax.f32 %v811_v57, %v897_v2  ;;  %v885_v12 = vrot.slane %v809_v6, 4 }
 0x2c5   : > { %v869_v11 = vrot.slane %v868_v5, 2  ;;  %v812_v13 = vmax.f32 %v794_v62, 0.0  ;;  %v786_v16 = vadd.f32 %v1358_v1, %v785_v42  ;;  %v866_v17 = vmax.f32 %v864_v60, %v865_v4 }
 0x2c6   : > { %1014 = vst [vmem:[%s1395_s25] sm:$0xf] %v1010_v7  ;;  %v883_v14 = vrot.slane %v882_v9, 1  ;;  %v899_v15 = vrot.slane %v898_v10, 2  ;;  %v886_v19 = vmax.f32 %v809_v6, %v885_v12  ;;  %v878_v21 = vmax.f32 %v876_v55, %v877_v8 }
 0x2c7   : > { %v870_v18 = vmax.f32 %v868_v5, %v869_v11  ;;  %v903_v20 = vrot.slane %v812_v13, 4  ;;  %v810_v23 = vmax.f32 %v786_v16, 0.0  ;;  %v1144_v29 = vpack.c.bf16 %v866_v17, %v866_v17 }
 0x2c8   : > { %v884_v22 = vmax.f32 %v882_v9, %v883_v14  ;;  %v900_v25 = vmax.f32 %v898_v10, %v899_v15  ;;  %v887_v26 = vrot.slane %v886_v19, 2  ;;  %v1146_v33 = vpack.c.bf16 %v878_v21, %v878_v21 }
 0x2c9   : > { %v871_v24 = vrot.slane %v870_v18, 1  ;;  %v904_v27 = vmax.f32 %v812_v13, %v903_v20  ;;  %v891_v28 = vrot.slane %v810_v23, 4  ;;  %v981_v40 = vunpack.c.l.b16 %v1144_v29 }
 0x2ca   : > { %v888_v31 = vmax.f32 %v886_v19, %v887_v26  ;;  %v1147_v34 = vpack.c.bf16 %v884_v22, %v884_v22  ;;  %v901_v36 = vrot.slane %v900_v25, 1  ;;  %v983_v44 = vunpack.c.l.b16 %v1146_v33 }
 0x2cb   : > { %v872_v30 = vmax.f32 %v870_v18, %v871_v24  ;;  %v905_v32 = vrot.slane %v904_v27, 2  ;;  %v892_v35 = vmax.f32 %v810_v23, %v891_v28 }
 0x2cc   : > { %v889_v37 = vrot.slane %v888_v31, 1  ;;  %v984_v46 = vunpack.c.l.b16 %v1147_v34  ;;  %v902_v48 = vmax.f32 %v900_v25, %v901_v36 }
 0x2cd   : > { %v1145_v1 = vpack.c.bf16 %v872_v30, %v872_v30  ;;  %v906_v38 = vmax.f32 %v904_v27, %v905_v32  ;;  %v893_v39 = vrot.slane %v892_v35, 2 }
 0x2ce   : > { %v890_v42 = vmax.f32 %v888_v31, %v889_v37  ;;  %v1150_v56 = vpack.c.bf16 %v902_v48, %v902_v48 }
 0x2cf   : > { %v982_v41 = vunpack.c.l.b16 %v1145_v1  ;;  %v907_v43 = vrot.slane %v906_v38, 1  ;;  %v894_v45 = vmax.f32 %v892_v35, %v893_v39 }
 0x2d0   : > { %v1148_v49 = vpack.c.bf16 %v890_v42, %v890_v42  ;;  %v987_v61 = vunpack.c.l.b16 %v1150_v56 }
 0x2d1   : > { %v1003_v47 = vsel %vm989_vm4, %v982_v41, %v981_v40  ;;  %v908_v51 = vmax.f32 %v906_v38, %v907_v43  ;;  %v895_v52 = vrot.slane %v894_v45, 1 }
 0x2d2   : > { %v1004_v50 = vsel %vm991_vm5, %v983_v44, %v1003_v47  ;;  %v985_v53 = vunpack.c.l.b16 %v1148_v49 }
 0x2d3   : > { %v1005_v54 = vsel %vm993_vm6, %v984_v46, %v1004_v50  ;;  %v896_v55 = vmax.f32 %v894_v45, %v895_v52  ;;  %v1151_v58 = vpack.c.bf16 %v908_v51, %v908_v51 }
 0x2d4   : > { %v1006_v57 = vsel %vm995_vm7, %v985_v53, %v1005_v54 }
 0x2d5   : > { %v1149_v59 = vpack.c.bf16 %v896_v55, %v896_v55  ;;  %v988_v62 = vunpack.c.l.b16 %v1151_v58 }
 0x2d7   : > { %v986_v60 = vunpack.c.l.b16 %v1149_v59 }
 0x2d9   : > { %v1007_v63 = vsel %vm997_vm8, %v986_v60, %v1006_v57 }
 0x2da   : > { %v1008_v0 = vsel %vm999_vm9, %v987_v61, %v1007_v63 }
 0x2db   : > { %v1009_v2 = vsel %vm1001_vm10, %v988_v62, %v1008_v0 }
 0x2dc   : > { %v1011_v3 = vpack.c.b16 %v1009_v2, %v1009_v2 }
 0x2de   : > { %1015 = vst [vmem:[%s1395_s25 + $0x4] sm:$0xf] %v1011_v3 }
 0x2df PF: > { %s17_s24 = sadd.s32 1, %s1260_s24  }
 0x2e0   : > { %p14_p5 = scmp.ge.s32.totalorder %s17_s24, 4  }
 0x2e2   :  { %16 = sbr.rel (!%p14_p5) target bundleno = 1 (0x1), region = 78 }

// kernel: custom-call.24
= control target key start
LH: loop header
LB: loop body
LE: loop exit
PB: predicated region body
PF: predicated region fallthrough
CT: control target
= control target key end

     0   :  { %s6_s0 = inlined_call_operand.vmem [shape: f32[2,8], index: 0, kind: output, shape index: {}]  }

// kernel: pointnet_plus_cls_forward.5
= control target key start
LH: loop header
LB: loop body
LE: loop exit
PB: predicated region body
PF: predicated region fallthrough
CT: control target
= control target key end

     0   :  { %s1063_s24 = smov 0   ;;  %s1155_s0 = inlined_call_operand.vmem [shape: bf16[128,131], index: 0, kind: input, shape index: {}]   ;;  %s1156_s1 = inlined_call_operand.vmem [shape: bf16[131,32], index: 1, kind: input, shape index: {}]   ;;  %s1157_s2 = inlined_call_operand.vmem [shape: f32[1,32], index: 2, kind: input, shape index: {}]   ;;  %s1158_s3 = inlined_call_operand.vmem [shape: bf16[32,32], index: 3, kind: input, shape index: {}]   ;;  %s1159_s4 = inlined_call_operand.vmem [shape: f32[1,32], index: 4, kind: input, shape index: {}]   ;;  %s1160_s5 = inlined_call_operand.vmem [shape: bf16[32,128], index: 5, kind: input, shape index: {}]   ;;  %s1161_s6 = inlined_call_operand.vmem [shape: f32[1,128], index: 6, kind: input, shape index: {}]   ;;  %s1162_s7 = inlined_call_operand.vmem [shape: bf16[16,128], index: 7, kind: output, shape index: {}]  }
   0x1 LB: > { %s1069_s25 = sadd.s32 4294967295, %s1019_s24   ;;  %p882_p0 = scmp.ge.s32.totalorder %s1019_s24, 1  ;;  %s1019_s24 = sphi %s1063_s24, %s17_s24  }
   0x2   : > { %p239_p1 = scmp.lt.s32.totalorder %s1019_s24, 3 }
   0x4   : > { %p240_p2 = pnand %p882_p0, %p239_p1 }
   0x5   : > { %v988_v0 = vld [vmem:[%s1156_s1] sm:$0xff] (!%p240_p2)   ;;  %v1021_v1 = vmov (!%p240_p2), 0   ;;  %v989_v2 = vld [vmem:[%s1156_s1 + $0x8] sm:$0xff] (!%p240_p2)   ;;  %v990_v3 = vld [vmem:[%s1156_s1 + $0x10] sm:$0xff] (!%p240_p2)   ;;  %s883_s9 = sshll.u32 (!%p240_p2), %s1069_s25, 3  ;;  %vm402_vm0 = vcmask (!%p240_p2), 23552  }
   0x6   : > { %243 = sbr.rel (%p240_p2) target bundleno = 749 (0x2ed), region = 48  ;;  %422 = vmatprep.subr.bf16.mxu0 (!%p240_p2), %v1021_v1  ;;  %p272_p3 = scmp.lt.s32.totalorder (!%p240_p2), %s883_s9, 15  ;;  %v991_v4 = vld [vmem:[%s1156_s1 + $0x18] sm:$0xff] (!%p240_p2)   ;;  %v992_v5 = vld [vmem:[%s1156_s1 + $0x20] sm:$0xff] (!%p240_p2)   ;;  %v993_v7 = vld [vmem:[%s1156_s1 + $0x28] sm:$0xff] (!%p240_p2)   ;;  %vm415_vm1 = vcmask (!%p240_p2), 1040384  }
   0x7   : > { %423 = vmatpush1.bf16.msra.mxu0 (!%p240_p2), %v988_v0  ;;  %v994_v8 = vld [vmem:[%s1156_s1 + $0x30] sm:$0xff] (!%p240_p2)   ;;  %vm416_vm2 = vcmask (!%p240_p2), 1041408   ;;  %v1022_v9 = vmov (!%p240_p2), 65535   ;;  %v995_v11 = vld [vmem:[%s1156_s1 + $0x38] sm:$0xff] (!%p240_p2)   ;;  %v1009_v22 = vld [vmem:[%s1158_s3] sm:$0xff] (!%p240_p2)   ;;  %vm522_vm3 = vcmask (!%p240_p2), 261120  }
   0x8   : > { %424 = vmatprep.subr.bf16.mxu0 (!%p240_p2), %v1021_v1  ;;  %v417_v10 = vsel (!%p240_p2), %vm415_vm1, 4294967295, %v1022_v9  ;;  %v996_v12 = vld [vmem:[%s1156_s1 + $0x40] ss:$0 sps:$4 sm:$0x33] (!%p240_p2)   ;;  %954 = vmatprep.subr.bf16.mxu1 (!%p240_p2), %v1009_v22  ;;  %v1010_v23 = vld [vmem:[%s1158_s3 + $0x8] sm:$0xff] (!%p240_p2)   ;;  %vm808_vm4 = vcmask (!%p240_p2), 1041409  }
   0x9   : > { %v418_v13 = vsel (!%p240_p2), %vm416_vm2, %v417_v10, 0  ;;  %955 = vmatpush3.bf16.msra.mxu1 (!%p240_p2), %v1009_v22  ;;  %v887_v24 = vld [vmem:[%s1157_s2] ss:$0 sm:$0xff] (!%p240_p2)  ;;  %v1012_v62 = vld [vmem:[%s1160_s5 + $0x8] sm:$0xff] (!%p240_p2)   ;;  %vm810_vm5 = vcmask (!%p240_p2), 1042434   ;;  %vm812_vm6 = vcmask (!%p240_p2), 1043459  }
   0xa   : > { %v420_v14 = vand.u32 (!%p240_p2), %v996_v12, %v418_v13  ;;  %956 = vmatprep.subr.bf16.mxu1 (!%p240_p2), %v1010_v23  ;;  %v1011_v61 = vld [vmem:[%s1160_s5] sm:$0xff] (!%p240_p2)   ;;  %p278_p4 = scmp.lt.s32.totalorder (!%p240_p2), %s1069_s25, 1  ;;  %vm814_vm7 = vcmask (!%p240_p2), 1044484   ;;  %vm816_vm8 = vcmask (!%p240_p2), 1045509   ;;  %vm818_vm9 = vcmask (!%p240_p2), 1046534  }
   0xb   : > { %425 = vmatpush1.bf16.msra.mxu0 (!%p240_p2), %v989_v2  ;;  %v909_v63 = vld [vmem:[%s1159_s4] ss:$0 sm:$0xff] (!%p240_p2)  ;;  %vm820_vm10 = vcmask (!%p240_p2), 1047559  }
   0xc   : > { %426 = vmatprep.subr.bf16.mxu0 (!%p240_p2), %v1021_v1 }
   0xd   : > { %s1164_s9 = smov (!%p272_p3, %s883_s9), 15  ;;  %957 = vmatpush3.bf16.msra.mxu1 %v1010_v23  ;;  %s1166_s25 = smov (!%p278_p4, %s1069_s25), 1 }
   0xe   : > { %s933_s12 = sshll.u32 %s1164_s9, 3  ;;  %966 = vmatprep.subr.bf16.mxu1 %v1011_v61  ;;  %s886_s19 = sshll.u32 %s1166_s25, 2 }
   0xf   : > { %427 = vmatpush1.bf16.msra.mxu0 %v990_v3  ;;  %s1089_s15 = scalar_lea.vmem %s1155_s0, %s933_s12  ;;  %s281_s22 = scalar_lea.vmem %s1162_s7, %s886_s19 }
  0x10   : > { %428 = vmatprep.subr.bf16.mxu0 %v1021_v1  ;;  %v999_v6 = vld [vmem:[%s1089_s15 + $0x4] ss:$8 sps:$4 sm:$0xff]   ;;  %v997_v15 = vld [vmem:[%s1089_s15] ss:$8 sps:$4 sm:$0xff]   ;;  %v1000_v16 = vld [vmem:[%s1089_s15 + $0x14] ss:$8 sps:$4 sm:$0xff]  }
  0x11   : > { %905 = vmatprep.mubr.msk.bf16.mxu0 %vm402_vm0, %v999_v6  ;;  %v1002_v17 = vld [vmem:[%s1089_s15 + $0x10] ss:$8 sps:$4 sm:$0xff]   ;;  %v1003_v18 = vld [vmem:[%s1089_s15 + $0x24] ss:$8 sps:$4 sm:$0xff]   ;;  %v1005_v19 = vld [vmem:[%s1089_s15 + $0x20] ss:$8 sps:$4 sm:$0xff]  }
  0x12   : > { %v1006_v20 = vld [vmem:[%s1089_s15 + $0x34] ss:$8 sps:$4 sm:$0xff]   ;;  %v1008_v21 = vld [vmem:[%s1089_s15 + $0x30] ss:$8 sps:$4 sm:$0xff]  }
  0x13   : > { %429 = vmatpush1.bf16.msra.mxu0 %v991_v4 }
  0x14   : > { %430 = vmatprep.subr.bf16.mxu0 %v1021_v1 }
  0x17   : > { %431 = vmatpush1.bf16.msra.mxu0 %v992_v5 }
  0x18   : > { %432 = vmatprep.subr.bf16.mxu0 %v1021_v1 }
  0x1b   : > { %433 = vmatpush1.bf16.msra.mxu0 %v993_v7 }
  0x1c   : > { %434 = vmatprep.subr.bf16.mxu0 %v1021_v1 }
  0x1f   : > { %435 = vmatpush1.bf16.msra.mxu0 %v994_v8 }
  0x20   : > { %436 = vmatprep.subr.bf16.mxu0 %v1021_v1 }
  0x23   : > { %437 = vmatpush1.bf16.msra.mxu0 %v995_v11 }
  0x24   : > { %438 = vmatprep.subr.bf16.mxu0 %v1021_v1 }
  0x27   : > { %439 = vmatpush1.bf16.msra.mxu0 %v420_v14 }
  0x2a   : > { %455 = vmatmul.mubr.bf16.vlgmr.msra.gmra.mrb[0].mxu0 %v997_v15 }
  0x2b   : > { %906 = vmatprep.mubr.msk.bf16.mxu0 %vm402_vm0, %v1000_v16 }
  0x32   : > { %463 = vmatmul.mubr.bf16.gmra.mrb[4].mxu0 %v1002_v17 }
  0x33   : > { %907 = vmatprep.mubr.msk.bf16.mxu0 %vm402_vm0, %v1003_v18 }
  0x3a   : > { %471 = vmatmul.mubr.bf16.gmra.mrb[8].mxu0 %v1005_v19 }
  0x3b   : > { %908 = vmatprep.mubr.msk.bf16.mxu0 %vm402_vm0, %v1006_v20 }
  0x42   : > { %479 = vmatmul.mubr.bf16.gmra.mrb[12].mxu0 %v1008_v21 }
  0xfd   : > { %v456_v25 = vpop.f32.mrb[0].mxu0 }
  0xfe   : > { %v457_v26 = vadd.f32 %v887_v24, %v456_v25  ;;  %v458_v27 = vpop.f32.mrb[1].mxu0 }
  0xff   : > { %v459_v28 = vpop.f32.mrb[2].mxu0 }
 0x100   : > { %v460_v29 = vadd.f32 %v887_v24, %v459_v28  ;;  %v461_v30 = vpop.f32.mrb[3].mxu0  ;;  %v487_v31 = vmax.f32 %v457_v26, 0.0  ;;  %v916_v28 = vld [vmem:[%s1161_s6] ss:$0 sm:$0xff] }
 0x102   : > { %v488_v32 = vmax.f32 %v460_v29, 0.0 }
 0x104   : > { %v495_v33 = vpack.c.bf16 %v488_v32, %v487_v31 }
 0x105   : > { %v464_v34 = vpop.f32.mrb[4].mxu0 }
 0x106   : > { %v465_v35 = vadd.f32 %v887_v24, %v464_v34  ;;  %v466_v36 = vpop.f32.mrb[5].mxu0  ;;  %958 = vmatprep.mubr.msk.bf16.mxu1 %vm522_vm3, %v495_v33 }
 0x107   : > { %v467_v37 = vpop.f32.mrb[6].mxu0 }
 0x108   : > { %v468_v38 = vadd.f32 %v887_v24, %v467_v37  ;;  %v469_v39 = vpop.f32.mrb[7].mxu0  ;;  %v489_v40 = vmax.f32 %v465_v35, 0.0 }
 0x10a   : > { %v490_v41 = vmax.f32 %v468_v38, 0.0 }
 0x10c   : > { %v496_v42 = vpack.c.bf16 %v490_v41, %v489_v40 }
 0x10d   : > { %v472_v43 = vpop.f32.mrb[8].mxu0 }
 0x10e   : > { %v473_v44 = vadd.f32 %v887_v24, %v472_v43  ;;  %v474_v45 = vpop.f32.mrb[9].mxu0  ;;  %959 = vmatmul.mubr.msk.bf16.vlgmr.msra.gmra.mrb[0].mxu1 %vm522_vm3, %v496_v42 }
 0x10f   : > { %v475_v46 = vpop.f32.mrb[10].mxu0  ;;  %967 = vmatpush3.bf16.msra.mxu1 %v1011_v61 }
 0x110   : > { %v476_v47 = vadd.f32 %v887_v24, %v475_v46  ;;  %v477_v48 = vpop.f32.mrb[11].mxu0  ;;  %v491_v49 = vmax.f32 %v473_v44, 0.0  ;;  %968 = vmatprep.subr.bf16.mxu1 %v1012_v62 }
 0x112   : > { %v492_v50 = vmax.f32 %v476_v47, 0.0 }
 0x113   : > { %969 = vmatpush3.bf16.msra.mxu1 %v1012_v62 }
 0x114   : > { %v497_v51 = vpack.c.bf16 %v492_v50, %v491_v49 }
 0x115   : > { %v480_v52 = vpop.f32.mrb[12].mxu0 }
 0x116   : > { %v481_v53 = vadd.f32 %v887_v24, %v480_v52  ;;  %v482_v54 = vpop.f32.mrb[13].mxu0  ;;  %962 = vmatprep.mubr.msk.bf16.mxu1 %vm522_vm3, %v497_v51 }
 0x117   : > { %v483_v55 = vpop.f32.mrb[14].mxu0 }
 0x118   : > { %v484_v56 = vadd.f32 %v887_v24, %v483_v55  ;;  %v485_v57 = vpop.f32.mrb[15].mxu0  ;;  %v493_v58 = vmax.f32 %v481_v53, 0.0 }
 0x11a   : > { %v494_v59 = vmax.f32 %v484_v56, 0.0 }
 0x11c   : > { %v498_v60 = vpack.c.bf16 %v494_v59, %v493_v58 }
 0x11e   : > { %963 = vmatmul.mubr.msk.bf16.gmra.mrb[4].mxu1 %vm522_vm3, %v498_v60 }
 0x1e1   : > { %v960_v0 = vpop.f32.mrb[0].mxu1 }
 0x1e2   : > { %v578_v1 = vadd.f32 %v960_v0, %v909_v63  ;;  %v569_v2 = vpop.f32.mrb[1].mxu1 }
 0x1e3   : > { %v570_v3 = vadd.f32 %v909_v63, %v569_v2  ;;  %v961_v4 = vpop.f32.mrb[2].mxu1 }
 0x1e4   : > { %v581_v5 = vadd.f32 %v961_v4, %v909_v63  ;;  %v572_v6 = vpop.f32.mrb[3].mxu1  ;;  %v602_v8 = vmax.f32 %v578_v1, 0.0 }
 0x1e5   : > { %v573_v7 = vadd.f32 %v909_v63, %v572_v6  ;;  %v600_v10 = vmax.f32 %v570_v3, 0.0 }
 0x1e6   : > { %v603_v9 = vmax.f32 %v581_v5, 0.0 }
 0x1e7   : > { %v601_v11 = vmax.f32 %v573_v7, 0.0 }
 0x1e8   : > { %v609_v12 = vpack.c.bf16 %v603_v9, %v602_v8 }
 0x1e9   : > { %v608_v13 = vpack.c.bf16 %v601_v11, %v600_v10 }
 0x1eb   : > { %970 = vmatprep.mubr.msk.bf16.mxu1 %vm522_vm3, %v608_v13 }
 0x1ec   : > { %971 = vmatmul.mubr.msk.bf16.vlgmr.msra.gmra.mrb[8].mxu1 %vm522_vm3, %v609_v12 }
 0x1f1   : > { %v964_v14 = vpop.f32.mrb[4].mxu1 }
 0x1f2   : > { %v594_v15 = vadd.f32 %v964_v14, %v909_v63  ;;  %v585_v16 = vpop.f32.mrb[5].mxu1 }
 0x1f3   : > { %v586_v17 = vadd.f32 %v909_v63, %v585_v16  ;;  %v965_v18 = vpop.f32.mrb[6].mxu1 }
 0x1f4   : > { %v597_v19 = vadd.f32 %v965_v18, %v909_v63  ;;  %v588_v20 = vpop.f32.mrb[7].mxu1  ;;  %v606_v22 = vmax.f32 %v594_v15, 0.0 }
 0x1f5   : > { %v589_v21 = vadd.f32 %v909_v63, %v588_v20  ;;  %v604_v24 = vmax.f32 %v586_v17, 0.0 }
 0x1f6   : > { %v607_v23 = vmax.f32 %v597_v19, 0.0 }
 0x1f7   : > { %v605_v25 = vmax.f32 %v589_v21, 0.0 }
 0x1f8   : > { %v611_v26 = vpack.c.bf16 %v607_v23, %v606_v22 }
 0x1f9   : > { %v610_v27 = vpack.c.bf16 %v605_v25, %v604_v24 }
 0x1fb   : > { %974 = vmatprep.mubr.msk.bf16.mxu1 %vm522_vm3, %v610_v27 }
 0x1fc   : > { %975 = vmatmul.mubr.msk.bf16.gmra.mrb[12].mxu1 %vm522_vm3, %v611_v26 }
 0x2bf   : > { %v972_v29 = vpop.f32.mrb[8].mxu1 }
 0x2c0   : > { %v690_v30 = vadd.f32 %v972_v29, %v916_v28  ;;  %v681_v31 = vpop.f32.mrb[9].mxu1 }
 0x2c1   : > { %v682_v32 = vadd.f32 %v916_v28, %v681_v31  ;;  %v973_v33 = vpop.f32.mrb[10].mxu1 }
 0x2c2   : > { %v714_v34 = vmax.f32 %v690_v30, 0.0  ;;  %v693_v35 = vadd.f32 %v973_v33, %v916_v28  ;;  %v684_v36 = vpop.f32.mrb[11].mxu1 }
 0x2c3   : > { %v712_v37 = vmax.f32 %v682_v32, 0.0  ;;  %v685_v38 = vadd.f32 %v916_v28, %v684_v36 }
 0x2c4   : > { %v732_v39 = vrot.slane %v714_v34, 4  ;;  %v715_v40 = vmax.f32 %v693_v35, 0.0 }
 0x2c5   : > { %v720_v41 = vrot.slane %v712_v37, 4  ;;  %v713_v42 = vmax.f32 %v685_v38, 0.0 }
 0x2c6   : > { %v733_v43 = vmax.f32 %v714_v34, %v732_v39  ;;  %v738_v44 = vrot.slane %v715_v40, 4 }
 0x2c7   : > { %v721_v45 = vmax.f32 %v712_v37, %v720_v41  ;;  %v726_v46 = vrot.slane %v713_v42, 4 }
 0x2c8   : > { %v734_v47 = vrot.slane %v733_v43, 2  ;;  %v739_v48 = vmax.f32 %v715_v40, %v738_v44 }
 0x2c9   : > { %v722_v49 = vrot.slane %v721_v45, 2  ;;  %v727_v50 = vmax.f32 %v713_v42, %v726_v46 }
 0x2ca   : > { %v735_v51 = vmax.f32 %v733_v43, %v734_v47  ;;  %v740_v52 = vrot.slane %v739_v48, 2 }
 0x2cb   : > { %v723_v53 = vmax.f32 %v721_v45, %v722_v49  ;;  %v728_v54 = vrot.slane %v727_v50, 2 }
 0x2cc   : > { %v736_v55 = vrot.slane %v735_v51, 1  ;;  %v741_v56 = vmax.f32 %v739_v48, %v740_v52 }
 0x2cd   : > { %v724_v57 = vrot.slane %v723_v53, 1  ;;  %v729_v58 = vmax.f32 %v727_v50, %v728_v54 }
 0x2ce   : > { %v737_v59 = vmax.f32 %v735_v51, %v736_v55  ;;  %v742_v60 = vrot.slane %v741_v56, 1 }
 0x2cf   : > { %v725_v61 = vmax.f32 %v723_v53, %v724_v57  ;;  %v730_v62 = vrot.slane %v729_v58, 1  ;;  %v976_v63 = vpop.f32.mrb[12].mxu1 }
 0x2d0   : > { %v743_v0 = vmax.f32 %v741_v56, %v742_v60  ;;  %v706_v1 = vadd.f32 %v976_v63, %v916_v28  ;;  %v697_v2 = vpop.f32.mrb[13].mxu1  ;;  %v936_v7 = vpack.c.bf16 %v737_v59, %v737_v59 }
 0x2d1   : > { %v934_v3 = vpack.c.bf16 %v725_v61, %v725_v61  ;;  %v731_v4 = vmax.f32 %v729_v58, %v730_v62  ;;  %v698_v5 = vadd.f32 %v916_v28, %v697_v2  ;;  %v977_v6 = vpop.f32.mrb[14].mxu1 }
 0x2d2   : > { %v718_v8 = vmax.f32 %v706_v1, 0.0  ;;  %v709_v9 = vadd.f32 %v977_v6, %v916_v28  ;;  %v700_v10 = vpop.f32.mrb[15].mxu1  ;;  %v937_v11 = vpack.c.bf16 %v743_v0, %v743_v0  ;;  %v802_v21 = vunpack.c.l.b16 %v936_v7 }
 0x2d3   : > { %v935_v12 = vpack.c.bf16 %v731_v4, %v731_v4  ;;  %v716_v13 = vmax.f32 %v698_v5, 0.0  ;;  %v701_v14 = vadd.f32 %v916_v28, %v700_v10  ;;  %v800_v17 = vunpack.c.l.b16 %v934_v3 }
 0x2d4   : > { %v756_v15 = vrot.slane %v718_v8, 4  ;;  %v719_v16 = vmax.f32 %v709_v9, 0.0  ;;  %v803_v24 = vunpack.c.l.b16 %v937_v11 }
 0x2d5   : > { %v801_v18 = vunpack.c.l.b16 %v935_v12  ;;  %v744_v19 = vrot.slane %v716_v13, 4  ;;  %v717_v20 = vmax.f32 %v701_v14, 0.0 }
 0x2d6   : > { %v757_v22 = vmax.f32 %v718_v8, %v756_v15  ;;  %v762_v23 = vrot.slane %v719_v16, 4 }
 0x2d7   : > { %v809_v25 = vsel %vm808_vm4, %v801_v18, %v800_v17  ;;  %v745_v26 = vmax.f32 %v716_v13, %v744_v19  ;;  %v750_v27 = vrot.slane %v717_v20, 4 }
 0x2d8   : > { %v811_v29 = vsel %vm810_vm5, %v802_v21, %v809_v25  ;;  %v758_v30 = vrot.slane %v757_v22, 2  ;;  %v763_v28 = vmax.f32 %v719_v16, %v762_v23 }
 0x2d9   : > { %v746_v31 = vrot.slane %v745_v26, 2  ;;  %v813_v32 = vsel %vm812_vm6, %v803_v24, %v811_v29  ;;  %v751_v33 = vmax.f32 %v717_v20, %v750_v27 }
 0x2da   : > { %v759_v34 = vmax.f32 %v757_v22, %v758_v30  ;;  %v764_v35 = vrot.slane %v763_v28, 2 }
 0x2db   : > { %v747_v36 = vmax.f32 %v745_v26, %v746_v31  ;;  %v752_v37 = vrot.slane %v751_v33, 2 }
 0x2dc   : > { %v760_v38 = vrot.slane %v759_v34, 1  ;;  %v765_v39 = vmax.f32 %v763_v28, %v764_v35 }
 0x2dd   : > { %v748_v40 = vrot.slane %v747_v36, 1  ;;  %v753_v41 = vmax.f32 %v751_v33, %v752_v37 }
 0x2de   : > { %v761_v42 = vmax.f32 %v759_v34, %v760_v38  ;;  %v766_v43 = vrot.slane %v765_v39, 1 }
 0x2df   : > { %v749_v44 = vmax.f32 %v747_v36, %v748_v40  ;;  %v754_v45 = vrot.slane %v753_v41, 1 }
 0x2e0   : > { %v767_v46 = vmax.f32 %v765_v39, %v766_v43  ;;  %v940_v49 = vpack.c.bf16 %v761_v42, %v761_v42 }
 0x2e1   : > { %v938_v47 = vpack.c.bf16 %v749_v44, %v749_v44  ;;  %v755_v48 = vmax.f32 %v753_v41, %v754_v45 }
 0x2e2   : > { %v941_v51 = vpack.c.bf16 %v767_v46, %v767_v46  ;;  %v806_v55 = vunpack.c.l.b16 %v940_v49 }
 0x2e3   : > { %v804_v50 = vunpack.c.l.b16 %v938_v47  ;;  %v939_v52 = vpack.c.bf16 %v755_v48, %v755_v48 }
 0x2e4   : > { %v807_v56 = vunpack.c.l.b16 %v941_v51 }
 0x2e5   : > { %v815_v53 = vsel %vm814_vm7, %v804_v50, %v813_v32  ;;  %v805_v54 = vunpack.c.l.b16 %v939_v52 }
 0x2e7   : > { %v817_v57 = vsel %vm816_vm8, %v805_v54, %v815_v53 }
 0x2e8   : > { %v819_v58 = vsel %vm818_vm9, %v806_v55, %v817_v57 }
 0x2e9   : > { %v821_v59 = vsel %vm820_vm10, %v807_v56, %v819_v58 }
 0x2ea   : > { %v822_v60 = vpack.c.b16 %v821_v59, %v821_v59 }
 0x2ec   : > { %824 = vst [vmem:[%s281_s22] sm:$0xf] %v822_v60 }
 0x2ed PF: > { %s17_s24 = sadd.s32 1, %s1019_s24  }
 0x2ee   : > { %p14_p5 = scmp.ge.s32.totalorder %s17_s24, 4  }
 0x2f0   :  { %16 = sbr.rel (!%p14_p5) target bundleno = 1 (0x1), region = 78 }

// kernel: pointnet_plus_cls_forward.7
= control target key start
LH: loop header
LB: loop body
LE: loop exit
PB: predicated region body
PF: predicated region fallthrough
CT: control target
= control target key end

     0   :  { %v112_v30 = vlaneseq  ;;  %v753_v34 = vmov 1966171168   ;;  %v754_v37 = vmov 0.0   ;;  %s935_s0 = inlined_call_operand.vmem [shape: bf16[2,512], index: 0, kind: input, shape index: {}]   ;;  %s936_s1 = inlined_call_operand.vmem [shape: bf16[512,64], index: 1, kind: input, shape index: {}]   ;;  %s937_s2 = inlined_call_operand.vmem [shape: f32[1,64], index: 2, kind: input, shape index: {}]   ;;  %s938_s3 = inlined_call_operand.vmem [shape: bf16[64,32], index: 3, kind: input, shape index: {}]   ;;  %s939_s4 = inlined_call_operand.vmem [shape: f32[1,32], index: 4, kind: input, shape index: {}]   ;;  %s940_s5 = inlined_call_operand.vmem [shape: bf16[32,5], index: 5, kind: input, shape index: {}]   ;;  %s941_s6 = inlined_call_operand.vmem [shape: f32[1,5], index: 6, kind: input, shape index: {}]   ;;  %s942_s7 = inlined_call_operand.hbm [shape: f32[2,5], index: 7, kind: output, shape index: {}]  }
   0x1   :  { %v691_v0 = vld [vmem:[%s936_s1 + $0x40] sm:$0xff]   ;;  %v695_v4 = vld [vmem:[%s936_s1 + $0x48] sm:$0xff]   ;;  %v699_v8 = vld [vmem:[%s936_s1 + $0x50] sm:$0xff]   ;;  %v110_v35 = vunpack.c.l.s4 %v753_v34 }
   0x2   :  { %v692_v1 = vld [vmem:[%s936_s1 + $0xc0] sm:$0xff]   ;;  %615 = vmatprep.subr.bf16.mxu0 %v691_v0  ;;  %v696_v5 = vld [vmem:[%s936_s1 + $0xc8] sm:$0xff]   ;;  %v700_v9 = vld [vmem:[%s936_s1 + $0xd0] sm:$0xff]   ;;  %v113_v36 = vshrl.u32 %v112_v30, 7 }
   0x3   :  { %v693_v2 = vld [vmem:[%s936_s1] sm:$0xff]   ;;  %637 = vmatprep.subr.bf16.mxu1 %v692_v1  ;;  %v697_v6 = vld [vmem:[%s936_s1 + $0x8] sm:$0xff]   ;;  %v701_v10 = vld [vmem:[%s936_s1 + $0x10] sm:$0xff]   ;;  %v111_v39 = vunpack.c.0.s8 %v110_v35 }
   0x4   :  { %v694_v3 = vld [vmem:[%s936_s1 + $0x80] sm:$0xff]   ;;  %616 = vmatpush3.bf16.msra.mxu0 %v693_v2  ;;  %v698_v7 = vld [vmem:[%s936_s1 + $0x88] sm:$0xff]   ;;  %v702_v11 = vld [vmem:[%s936_s1 + $0x90] sm:$0xff]  }
   0x5   :  { %638 = vmatpush3.bf16.msra.mxu1 %v694_v3  ;;  %617 = vmatprep.subr.bf16.mxu0 %v695_v4  ;;  %v703_v12 = vld [vmem:[%s936_s1 + $0x58] sm:$0xff]   ;;  %v707_v16 = vld [vmem:[%s936_s1 + $0x60] sm:$0xff]   ;;  %v711_v20 = vld [vmem:[%s936_s1 + $0x68] sm:$0xff]   ;;  %v114_v40 = vsub.s32 %v111_v39, %v113_v36 }
   0x6   :  { %639 = vmatprep.subr.bf16.mxu1 %v696_v5  ;;  %v704_v13 = vld [vmem:[%s936_s1 + $0xd8] sm:$0xff]   ;;  %v708_v17 = vld [vmem:[%s936_s1 + $0xe0] sm:$0xff]   ;;  %v712_v21 = vld [vmem:[%s936_s1 + $0xe8] sm:$0xff]  }
   0x7   :  { %v705_v14 = vld [vmem:[%s936_s1 + $0x18] sm:$0xff]   ;;  %v709_v18 = vld [vmem:[%s936_s1 + $0x20] sm:$0xff]   ;;  %v713_v22 = vld [vmem:[%s936_s1 + $0x28] sm:$0xff]  }
   0x8   :  { %618 = vmatpush3.bf16.msra.mxu0 %v697_v6  ;;  %v706_v15 = vld [vmem:[%s936_s1 + $0x98] sm:$0xff]   ;;  %v710_v19 = vld [vmem:[%s936_s1 + $0xa0] sm:$0xff]   ;;  %v714_v23 = vld [vmem:[%s936_s1 + $0xa8] sm:$0xff]  }
   0x9   :  { %640 = vmatpush3.bf16.msra.mxu1 %v698_v7  ;;  %619 = vmatprep.subr.bf16.mxu0 %v699_v8  ;;  %v715_v24 = vld [vmem:[%s936_s1 + $0x70] sm:$0xff]   ;;  %v719_v28 = vld [vmem:[%s936_s1 + $0x78] sm:$0xff]   ;;  %v572_v33 = vld.sshfl [vmem:[%s935_s0] sm:$0x33 pattern:$0x75316420] }
   0xa   :  { %641 = vmatprep.subr.bf16.mxu1 %v700_v9  ;;  %v716_v25 = vld [vmem:[%s936_s1 + $0xf0] sm:$0xff]   ;;  %v720_v29 = vld [vmem:[%s936_s1 + $0xf8] sm:$0xff]   ;;  %v108_v38 = vcombine.high %v572_v33, %v572_v33 }
   0xb   :  { %v717_v26 = vld [vmem:[%s936_s1 + $0x30] sm:$0xff]   ;;  %v721_v31 = vld [vmem:[%s936_s1 + $0x38] sm:$0xff]  }
   0xc   :  { %620 = vmatpush3.bf16.msra.mxu0 %v701_v10  ;;  %v718_v27 = vld [vmem:[%s936_s1 + $0xb0] sm:$0xff]   ;;  %v722_v32 = vld [vmem:[%s936_s1 + $0xb8] sm:$0xff]  }
   0xd   :  { %642 = vmatpush3.bf16.msra.mxu1 %v702_v11  ;;  %621 = vmatprep.subr.bf16.mxu0 %v703_v12 }
   0xe   :  { %643 = vmatprep.subr.bf16.mxu1 %v704_v13 }
  0x10   :  { %622 = vmatpush3.bf16.msra.mxu0 %v705_v14 }
  0x11   :  { %644 = vmatpush3.bf16.msra.mxu1 %v706_v15  ;;  %623 = vmatprep.subr.bf16.mxu0 %v707_v16 }
  0x12   :  { %645 = vmatprep.subr.bf16.mxu1 %v708_v17 }
  0x14   :  { %624 = vmatpush3.bf16.msra.mxu0 %v709_v18 }
  0x15   :  { %646 = vmatpush3.bf16.msra.mxu1 %v710_v19  ;;  %625 = vmatprep.subr.bf16.mxu0 %v711_v20 }
  0x16   :  { %647 = vmatprep.subr.bf16.mxu1 %v712_v21 }
  0x18   :  { %626 = vmatpush3.bf16.msra.mxu0 %v713_v22 }
  0x19   :  { %648 = vmatpush3.bf16.msra.mxu1 %v714_v23  ;;  %627 = vmatprep.subr.bf16.mxu0 %v715_v24 }
  0x1a   :  { %649 = vmatprep.subr.bf16.mxu1 %v716_v25 }
  0x1c   :  { %628 = vmatpush3.bf16.msra.mxu0 %v717_v26 }
  0x1d   :  { %650 = vmatpush3.bf16.msra.mxu1 %v718_v27  ;;  %629 = vmatprep.subr.bf16.mxu0 %v719_v28 }
  0x1e   :  { %651 = vmatprep.subr.bf16.mxu1 %v720_v29 }
  0x20   :  { %630 = vmatpush3.bf16.msra.mxu0 %v721_v31 }
  0x21   :  { %652 = vmatpush3.bf16.msra.mxu1 %v722_v32  ;;  %667 = vmatprep.subr.bf16.mxu0 %v754_v37 }
  0x22   :  { %679 = vmatprep.subr.bf16.mxu1 %v754_v37 }
  0x23   :  { %12 = vsyncpa [#allocation3], 0  ;;  %v122_v41 = vrot.slane %v108_v38, %v114_v40  ;;  %v115_v42 = vrot.slane %v572_v33, %v114_v40  ;;  %v723_v43 = vld [vmem:[%s938_s3] sm:$0xff]   ;;  %v724_v46 = vld [vmem:[%s938_s3 + $0x8] sm:$0xff]   ;;  %vm755_vm0 = vmmov 0   ;;  %vm442_vm1 = vcmask 523264  }
  0x24   :  { %v725_v47 = vld [vmem:[%s938_s3 + $0x10] sm:$0xff]   ;;  %v726_v48 = vld [vmem:[%s938_s3 + $0x18] sm:$0xff]   ;;  %v727_v49 = vld [vmem:[%s940_s5] sm:$0xff]   ;;  %vm511_vm2 = vcmask 261120   ;;  %s756_s12 = smov [#allocation2]   ;;  %vm555_vm3 = vcmask 33792  }
  0x25   :  { %353 = vmatprep.mubr.bf16.mxu0 %v122_v41  ;;  %v124_v44 = vcombine.high %v122_v41, %v122_v41  ;;  %v123_v45 = vcombine.high %v115_v42, %v115_v42  ;;  %v571_v51 = vld [vmem:[%s937_s2] ss:$0 sm:$0xff]  ;;  %v728_v1 = vld [vmem:[%s940_s5 + $0x8] sm:$0xff]   ;;  %s563_s5 = sshll.u32 %s756_s12, 4  ;;  %s564_s5 = int_to_ptr.vmem [resolvable:$true] %s563_s5 }
  0x26   :  { %354 = vmatmul.mubr.bf16.vlgmr.msra.gmra.mrb[0].mxu0 %v115_v42  ;;  %v605_v2 = vld [vmem:[%s939_s4] ss:$0 sm:$0xff]  ;;  %s729_s4 = scalar_lea.vmem %s564_s5, 32  ;;  %p734_p1 = scmp.lt.s32.totalorder %s564_s5, %s564_s5 }
  0x27   :  { %393 = vmatprep.mubr.bf16.mxu1 %v124_v44  ;;  %668 = vmatpush3.bf16.msra.mxu0 %v723_v43  ;;  %v611_v10 = vld [vmem:[%s941_s6] ss:$0 sm:$0xff]  ;;  %p730_p0 = scmp.ne.s32.totalorder %s564_s5, %s729_s4  ;;  %p735_p2 = scmp.lt.s32.totalorder %s729_s4, %s729_s4 }
  0x28   :  { %394 = vmatmul.mubr.bf16.vlgmr.msra.gmra.mrb[0].mxu1 %v123_v45  ;;  %669 = vmatprep.subr.bf16.mxu0 %v754_v37 }
  0x29   :  { %675 = vmatprep.mubr.msk.bf16.mxu0 %vm755_vm0, %v754_v37  ;;  %683 = vmatprep.mubr.msk.bf16.mxu1 %vm755_vm0, %v754_v37  ;;  %p736_p3 = por %p735_p2, %p734_p1 }
  0x2a   :  { %680 = vmatpush3.bf16.msra.mxu1 %v727_v49 }
  0x2b   :  { %670 = vmatpush3.bf16.msra.mxu0 %v724_v46  ;;  %681 = vmatprep.subr.bf16.mxu1 %v754_v37  ;;  %p737_p4 = pnand %p736_p3, %p730_p0 }
  0x2c   :  { %671 = vmatprep.subr.bf16.mxu0 %v754_v37 }
  0x2e   :  { %682 = vmatpush3.bf16.msra.mxu1 %v728_v1 }
  0x2f   :  { %672 = vmatpush3.bf16.msra.mxu0 %v725_v47 }
  0x30   :  { %673 = vmatprep.subr.bf16.mxu0 %v754_v37 }
  0x33   :  { %674 = vmatpush3.bf16.msra.mxu0 %v726_v48 }
  0xf9   :  { %v631_v50 = vpop.f32.mrb[0].mxu0 }
  0xfa   :  { %v632_v52 = vpop.f32.mrb[1].mxu0 }
  0xfb   :  { %v653_v53 = vpop.f32.mrb[0].mxu1  ;;  %v633_v54 = vadd.f32 %v632_v52, %v631_v50  ;;  %v634_v55 = vpop.f32.mrb[2].mxu0 }
  0xfc   :  { %v654_v56 = vpop.f32.mrb[1].mxu1  ;;  %v635_v57 = vpop.f32.mrb[3].mxu0 }
  0xfd   :  { %v356_v58 = vadd.f32 %v633_v54, %v571_v51  ;;  %v655_v59 = vadd.f32 %v654_v56, %v653_v53  ;;  %v656_v60 = vpop.f32.mrb[2].mxu1 }
  0xfe   :  { %v657_v61 = vpop.f32.mrb[3].mxu1 }
  0xff   :  { %v396_v62 = vadd.f32 %v655_v59, %v356_v58 }
 0x101   :  { %v401_v63 = vmax.f32 %v396_v62, 0.0 }
 0x103   :  { %v402_v0 = vpack.c.bf16 %v401_v63, %v401_v63 }
 0x105   :  { %676 = vmatmul.mubr.msk.bf16.vlgmr.msra.gmra.mrb[4].mxu0 %vm442_vm1, %v402_v0 }
 0x1d8   :  { %v480_v3 = vpop.f32.mrb[4].mxu0 }
 0x1d9   :  { %v481_v4 = vadd.f32 %v605_v2, %v480_v3  ;;  %v677_v5 = vpop.f32.mrb[5].mxu0 }
 0x1da   :  { %v483_v6 = vpop.f32.mrb[6].mxu0 }
 0x1db   :  { %v486_v7 = vmax.f32 %v481_v4, 0.0  ;;  %v678_v8 = vpop.f32.mrb[7].mxu0 }
 0x1dd   :  { %v487_v9 = vpack.c.bf16 %v486_v7, %v486_v7 }
 0x1df   :  { %684 = vmatmul.mubr.msk.bf16.vlgmr.msra.gmra.mrb[4].mxu1 %vm511_vm2, %v487_v9 }
 0x2b2   :  { %v549_v11 = vpop.f32.mrb[4].mxu1 }
 0x2b3   :  { %v550_v12 = vadd.f32 %v611_v10, %v549_v11  ;;  %v685_v13 = vpop.f32.mrb[5].mxu1 }
 0x2b4   :  { %v552_v14 = vpop.f32.mrb[6].mxu1 }
 0x2b5   :  { %v686_v15 = vpop.f32.mrb[7].mxu1  ;;  %556 = vst.msk [vmem:[#allocation2] sm:$0x3] %vm555_vm3, %v550_v12 }
 0x2b6   :  { %740 = shalt.err (!%p737_p4)
}
 0x2b7   :  { %s741_s6 = scalar_lea.hbm %s942_s7, 32 }
 0x2b8   :  { %p742_p5 = scmp.ne.s32.totalorder %s942_s7, %s741_s6  ;;  %p745_p6 = scmp.lt.u32.totalorder %s741_s6, %s942_s7 }
 0x2ba   :  { %p747_p7 = pnand %p745_p6, %p742_p5 }
 0x2bc   :  { %750 = shalt.err (!%p747_p7)
}
 0x2bd   :  { %566 = dma.vmem_to_hbm [thread:$0]  %s564_s5, 32, %s942_s7, [#allocation3]  }
 0x2be   :  { %751 = dma.done.wait [#allocation3], 32  }
 0x2bf   :  { %752 = vsyncadd [#allocation3], 4294967264 }
 0x2c0   :  { %570 = vsyncpa [#allocation3], 1 }

// kernel: pointnet_plus_cls_forward.6
= control target key start
LH: loop header
LB: loop body
LE: loop exit
PB: predicated region body
PF: predicated region fallthrough
CT: control target
= control target key end

     0   :  { %v740_v0 = vmov 0   ;;  %vm146_vm0 = vcmask 23552   ;;  %vm159_vm1 = vcmask 1040384   ;;  %vm160_vm2 = vcmask 1041408   ;;  %s881_s1 = inlined_call_operand.vmem [shape: bf16[131,64], index: 1, kind: input, shape index: {}]   ;;  %s882_s0 = inlined_call_operand.vmem [shape: bf16[64,131], index: 0, kind: input, shape index: {}]   ;;  %s883_s3 = inlined_call_operand.vmem [shape: bf16[64,64], index: 3, kind: input, shape index: {}]   ;;  %s884_s5 = inlined_call_operand.vmem [shape: bf16[64,128], index: 5, kind: input, shape index: {}]   ;;  %s885_s2 = inlined_call_operand.vmem [shape: f32[1,64], index: 2, kind: input, shape index: {}]   ;;  %s886_s4 = inlined_call_operand.vmem [shape: f32[1,64], index: 4, kind: input, shape index: {}]   ;;  %s887_s6 = inlined_call_operand.vmem [shape: f32[1,128], index: 6, kind: input, shape index: {}]   ;;  %s888_s7 = inlined_call_operand.vmem [shape: bf16[8,128], index: 7, kind: output, shape index: {}]  }
   0x1   :  { %166 = vmatprep.subr.bf16.mxu0 %v740_v0  ;;  %v711_v1 = vld [vmem:[%s881_s1] sm:$0xff]   ;;  %v712_v2 = vld [vmem:[%s881_s1 + $0x8] sm:$0xff]   ;;  %v713_v3 = vld [vmem:[%s881_s1 + $0x10] sm:$0xff]   ;;  %v741_v9 = vmov 65535   ;;  %vm282_vm3 = vcmask 523264   ;;  %vm584_vm4 = vcmask 1041409  }
   0x2   :  { %167 = vmatpush1.bf16.msra.mxu0 %v711_v1  ;;  %v722_v4 = vld [vmem:[%s882_s0 + $0x4] ss:$8 sps:$4 sm:$0xff]   ;;  %v714_v5 = vld [vmem:[%s881_s1 + $0x18] sm:$0xff]   ;;  %v717_v8 = vld [vmem:[%s881_s1 + $0x30] sm:$0xff]   ;;  %v161_v10 = vsel %vm159_vm1, 4294967295, %v741_v9  ;;  %vm586_vm5 = vcmask 1042434  }
   0x3   :  { %168 = vmatprep.subr.bf16.mxu0 %v740_v0  ;;  %623 = vmatprep.mubr.msk.bf16.mxu0 %vm146_vm0, %v722_v4  ;;  %v715_v6 = vld [vmem:[%s881_s1 + $0x20] sm:$0xff]   ;;  %v716_v7 = vld [vmem:[%s881_s1 + $0x28] sm:$0xff]   ;;  %v718_v11 = vld [vmem:[%s881_s1 + $0x38] sm:$0xff]   ;;  %v162_v13 = vsel %vm160_vm2, %v161_v10, 0  ;;  %vm588_vm6 = vcmask 1043459   ;;  %vm590_vm7 = vcmask 1044484  }
   0x4   :  { %v719_v12 = vld [vmem:[%s881_s1 + $0x40] ss:$0 sps:$4 sm:$0x33]   ;;  %v723_v16 = vld [vmem:[%s882_s0 + $0x14] ss:$8 sps:$4 sm:$0xff]   ;;  %v733_v23 = vld [vmem:[%s883_s3 + $0x8] sm:$0xff]  }
   0x5   :  { %v164_v14 = vand.u32 %v719_v12, %v162_v13  ;;  %v720_v15 = vld [vmem:[%s882_s0] ss:$8 sps:$4 sm:$0xff]   ;;  %v725_v17 = vld [vmem:[%s882_s0 + $0x10] ss:$8 sps:$4 sm:$0xff]   ;;  %v726_v18 = vld [vmem:[%s882_s0 + $0x24] ss:$8 sps:$4 sm:$0xff]  }
   0x6   :  { %169 = vmatpush1.bf16.msra.mxu0 %v712_v2  ;;  %v728_v19 = vld [vmem:[%s882_s0 + $0x20] ss:$8 sps:$4 sm:$0xff]   ;;  %v729_v20 = vld [vmem:[%s882_s0 + $0x34] ss:$8 sps:$4 sm:$0xff]   ;;  %v731_v21 = vld [vmem:[%s882_s0 + $0x30] ss:$8 sps:$4 sm:$0xff]  }
   0x7   :  { %170 = vmatprep.subr.bf16.mxu0 %v740_v0  ;;  %v732_v22 = vld [vmem:[%s883_s3] sm:$0xff]   ;;  %v734_v24 = vld [vmem:[%s883_s3 + $0x10] sm:$0xff]   ;;  %v735_v25 = vld [vmem:[%s883_s3 + $0x18] sm:$0xff]   ;;  %vm592_vm8 = vcmask 1045509   ;;  %vm594_vm9 = vcmask 1046534   ;;  %vm596_vm10 = vcmask 1047559  }
   0x8   :  { %677 = vmatprep.subr.bf16.mxu1 %v732_v22  ;;  %v736_v26 = vld [vmem:[%s884_s5] sm:$0xff]   ;;  %v737_v46 = vld [vmem:[%s884_s5 + $0x8] sm:$0xff]   ;;  %v738_v1 = vld [vmem:[%s884_s5 + $0x10] sm:$0xff]  }
   0x9   :  { %678 = vmatpush3.bf16.msra.mxu1 %v732_v22  ;;  %v605_v27 = vld [vmem:[%s885_s2] ss:$0 sm:$0xff]  ;;  %v739_v2 = vld [vmem:[%s884_s5 + $0x18] sm:$0xff]  }
   0xa   :  { %171 = vmatpush1.bf16.msra.mxu0 %v713_v3  ;;  %679 = vmatprep.subr.bf16.mxu1 %v733_v23  ;;  %v627_v3 = vld [vmem:[%s886_s4] ss:$0 sm:$0xff] }
   0xb   :  { %172 = vmatprep.subr.bf16.mxu0 %v740_v0 }
   0xd   :  { %680 = vmatpush3.bf16.msra.mxu1 %v733_v23 }
   0xe   :  { %173 = vmatpush1.bf16.msra.mxu0 %v714_v5  ;;  %681 = vmatprep.subr.bf16.mxu1 %v734_v24 }
   0xf   :  { %174 = vmatprep.subr.bf16.mxu0 %v740_v0 }
  0x11   :  { %682 = vmatpush3.bf16.msra.mxu1 %v734_v24 }
  0x12   :  { %175 = vmatpush1.bf16.msra.mxu0 %v715_v6  ;;  %683 = vmatprep.subr.bf16.mxu1 %v735_v25 }
  0x13   :  { %176 = vmatprep.subr.bf16.mxu0 %v740_v0 }
  0x15   :  { %684 = vmatpush3.bf16.msra.mxu1 %v735_v25 }
  0x16   :  { %177 = vmatpush1.bf16.msra.mxu0 %v716_v7  ;;  %693 = vmatprep.subr.bf16.mxu1 %v736_v26 }
  0x17   :  { %178 = vmatprep.subr.bf16.mxu0 %v740_v0 }
  0x1a   :  { %179 = vmatpush1.bf16.msra.mxu0 %v717_v8 }
  0x1b   :  { %180 = vmatprep.subr.bf16.mxu0 %v740_v0 }
  0x1e   :  { %181 = vmatpush1.bf16.msra.mxu0 %v718_v11 }
  0x1f   :  { %182 = vmatprep.subr.bf16.mxu0 %v740_v0 }
  0x22   :  { %183 = vmatpush1.bf16.msra.mxu0 %v164_v14 }
  0x25   :  { %199 = vmatmul.mubr.bf16.vlgmr.msra.gmra.mrb[0].mxu0 %v720_v15 }
  0x26   :  { %624 = vmatprep.mubr.msk.bf16.mxu0 %vm146_vm0, %v723_v16 }
  0x2d   :  { %207 = vmatmul.mubr.bf16.gmra.mrb[4].mxu0 %v725_v17 }
  0x2e   :  { %625 = vmatprep.mubr.msk.bf16.mxu0 %vm146_vm0, %v726_v18 }
  0x35   :  { %215 = vmatmul.mubr.bf16.gmra.mrb[8].mxu0 %v728_v19 }
  0x36   :  { %626 = vmatprep.mubr.msk.bf16.mxu0 %vm146_vm0, %v729_v20 }
  0x3d   :  { %223 = vmatmul.mubr.bf16.gmra.mrb[12].mxu0 %v731_v21 }
  0xf8   :  { %v200_v28 = vpop.f32.mrb[0].mxu0 }
  0xf9   :  { %v201_v29 = vadd.f32 %v605_v27, %v200_v28  ;;  %v202_v30 = vpop.f32.mrb[1].mxu0 }
  0xfa   :  { %v203_v31 = vpop.f32.mrb[2].mxu0 }
  0xfb   :  { %v204_v32 = vadd.f32 %v605_v27, %v203_v31  ;;  %v205_v33 = vpop.f32.mrb[3].mxu0  ;;  %v231_v34 = vmax.f32 %v201_v29, 0.0 }
  0xfd   :  { %v232_v35 = vmax.f32 %v204_v32, 0.0  ;;  %v636_v32 = vld [vmem:[%s887_s6] ss:$0 sm:$0xff] }
  0xff   :  { %v239_v36 = vpack.c.bf16 %v232_v35, %v231_v34 }
 0x100   :  { %v208_v37 = vpop.f32.mrb[4].mxu0 }
 0x101   :  { %v209_v38 = vadd.f32 %v605_v27, %v208_v37  ;;  %v210_v39 = vpop.f32.mrb[5].mxu0  ;;  %685 = vmatprep.mubr.msk.bf16.mxu1 %vm282_vm3, %v239_v36 }
 0x102   :  { %v211_v40 = vpop.f32.mrb[6].mxu0 }
 0x103   :  { %v212_v41 = vadd.f32 %v605_v27, %v211_v40  ;;  %v213_v42 = vpop.f32.mrb[7].mxu0  ;;  %v233_v43 = vmax.f32 %v209_v38, 0.0 }
 0x105   :  { %v234_v44 = vmax.f32 %v212_v41, 0.0 }
 0x107   :  { %v240_v45 = vpack.c.bf16 %v234_v44, %v233_v43 }
 0x108   :  { %v216_v47 = vpop.f32.mrb[8].mxu0 }
 0x109   :  { %v217_v48 = vadd.f32 %v605_v27, %v216_v47  ;;  %v218_v49 = vpop.f32.mrb[9].mxu0  ;;  %686 = vmatmul.mubr.msk.bf16.vlgmr.msra.gmra.mrb[0].mxu1 %vm282_vm3, %v240_v45 }
 0x10a   :  { %v219_v50 = vpop.f32.mrb[10].mxu0  ;;  %694 = vmatpush3.bf16.msra.mxu1 %v736_v26 }
 0x10b   :  { %v220_v51 = vadd.f32 %v605_v27, %v219_v50  ;;  %v221_v52 = vpop.f32.mrb[11].mxu0  ;;  %695 = vmatprep.subr.bf16.mxu1 %v737_v46  ;;  %v235_v53 = vmax.f32 %v217_v48, 0.0 }
 0x10d   :  { %v236_v54 = vmax.f32 %v220_v51, 0.0 }
 0x10e   :  { %696 = vmatpush3.bf16.msra.mxu1 %v737_v46 }
 0x10f   :  { %v241_v55 = vpack.c.bf16 %v236_v54, %v235_v53  ;;  %697 = vmatprep.subr.bf16.mxu1 %v738_v1 }
 0x110   :  { %v224_v56 = vpop.f32.mrb[12].mxu0 }
 0x111   :  { %v225_v57 = vadd.f32 %v605_v27, %v224_v56  ;;  %v226_v58 = vpop.f32.mrb[13].mxu0  ;;  %689 = vmatprep.mubr.msk.bf16.mxu1 %vm282_vm3, %v241_v55 }
 0x112   :  { %v227_v59 = vpop.f32.mrb[14].mxu0  ;;  %698 = vmatpush3.bf16.msra.mxu1 %v738_v1 }
 0x113   :  { %v228_v60 = vadd.f32 %v605_v27, %v227_v59  ;;  %v229_v61 = vpop.f32.mrb[15].mxu0  ;;  %v237_v62 = vmax.f32 %v225_v57, 0.0  ;;  %699 = vmatprep.subr.bf16.mxu1 %v739_v2 }
 0x115   :  { %v238_v63 = vmax.f32 %v228_v60, 0.0 }
 0x116   :  { %700 = vmatpush3.bf16.msra.mxu1 %v739_v2 }
 0x117   :  { %v242_v0 = vpack.c.bf16 %v238_v63, %v237_v62 }
 0x119   :  { %690 = vmatmul.mubr.msk.bf16.gmra.mrb[4].mxu1 %vm282_vm3, %v242_v0 }
 0x1dc   :  { %v687_v4 = vpop.f32.mrb[0].mxu1 }
 0x1dd   :  { %v338_v5 = vadd.f32 %v687_v4, %v627_v3  ;;  %v329_v6 = vpop.f32.mrb[1].mxu1 }
 0x1de   :  { %v330_v7 = vadd.f32 %v627_v3, %v329_v6  ;;  %v688_v8 = vpop.f32.mrb[2].mxu1 }
 0x1df   :  { %v341_v9 = vadd.f32 %v688_v8, %v627_v3  ;;  %v332_v10 = vpop.f32.mrb[3].mxu1  ;;  %v362_v12 = vmax.f32 %v338_v5, 0.0 }
 0x1e0   :  { %v333_v11 = vadd.f32 %v627_v3, %v332_v10  ;;  %v360_v14 = vmax.f32 %v330_v7, 0.0 }
 0x1e1   :  { %v363_v13 = vmax.f32 %v341_v9, 0.0 }
 0x1e2   :  { %v361_v15 = vmax.f32 %v333_v11, 0.0 }
 0x1e3   :  { %v369_v16 = vpack.c.bf16 %v363_v13, %v362_v12 }
 0x1e4   :  { %v368_v17 = vpack.c.bf16 %v361_v15, %v360_v14 }
 0x1e6   :  { %701 = vmatprep.mubr.msk.bf16.mxu1 %vm282_vm3, %v368_v17 }
 0x1e7   :  { %702 = vmatmul.mubr.msk.bf16.vlgmr.msra.gmra.mrb[8].mxu1 %vm282_vm3, %v369_v16 }
 0x1ec   :  { %v691_v18 = vpop.f32.mrb[4].mxu1 }
 0x1ed   :  { %v354_v19 = vadd.f32 %v691_v18, %v627_v3  ;;  %v345_v20 = vpop.f32.mrb[5].mxu1 }
 0x1ee   :  { %v346_v21 = vadd.f32 %v627_v3, %v345_v20  ;;  %v692_v22 = vpop.f32.mrb[6].mxu1 }
 0x1ef   :  { %v357_v23 = vadd.f32 %v692_v22, %v627_v3  ;;  %v348_v24 = vpop.f32.mrb[7].mxu1  ;;  %v366_v26 = vmax.f32 %v354_v19, 0.0 }
 0x1f0   :  { %v349_v25 = vadd.f32 %v627_v3, %v348_v24  ;;  %v364_v28 = vmax.f32 %v346_v21, 0.0 }
 0x1f1   :  { %v367_v27 = vmax.f32 %v357_v23, 0.0 }
 0x1f2   :  { %v365_v29 = vmax.f32 %v349_v25, 0.0 }
 0x1f3   :  { %v371_v30 = vpack.c.bf16 %v367_v27, %v366_v26 }
 0x1f4   :  { %v370_v31 = vpack.c.bf16 %v365_v29, %v364_v28 }
 0x1f6   :  { %705 = vmatprep.mubr.msk.bf16.mxu1 %vm282_vm3, %v370_v31 }
 0x1f7   :  { %706 = vmatmul.mubr.msk.bf16.gmra.mrb[12].mxu1 %vm282_vm3, %v371_v30 }
 0x2ba   :  { %v703_v33 = vpop.f32.mrb[8].mxu1 }
 0x2bb   :  { %v466_v34 = vadd.f32 %v703_v33, %v636_v32  ;;  %v457_v35 = vpop.f32.mrb[9].mxu1 }
 0x2bc   :  { %v458_v36 = vadd.f32 %v636_v32, %v457_v35  ;;  %v704_v37 = vpop.f32.mrb[10].mxu1 }
 0x2bd   :  { %v490_v38 = vmax.f32 %v466_v34, 0.0  ;;  %v469_v39 = vadd.f32 %v704_v37, %v636_v32  ;;  %v460_v40 = vpop.f32.mrb[11].mxu1 }
 0x2be   :  { %v488_v41 = vmax.f32 %v458_v36, 0.0  ;;  %v461_v42 = vadd.f32 %v636_v32, %v460_v40 }
 0x2bf   :  { %v508_v43 = vrot.slane %v490_v38, 4  ;;  %v491_v44 = vmax.f32 %v469_v39, 0.0 }
 0x2c0   :  { %v496_v45 = vrot.slane %v488_v41, 4  ;;  %v489_v46 = vmax.f32 %v461_v42, 0.0 }
 0x2c1   :  { %v509_v47 = vmax.f32 %v490_v38, %v508_v43  ;;  %v514_v48 = vrot.slane %v491_v44, 4 }
 0x2c2   :  { %v497_v49 = vmax.f32 %v488_v41, %v496_v45  ;;  %v502_v50 = vrot.slane %v489_v46, 4 }
 0x2c3   :  { %v510_v51 = vrot.slane %v509_v47, 2  ;;  %v515_v52 = vmax.f32 %v491_v44, %v514_v48 }
 0x2c4   :  { %v498_v53 = vrot.slane %v497_v49, 2  ;;  %v503_v54 = vmax.f32 %v489_v46, %v502_v50 }
 0x2c5   :  { %v511_v55 = vmax.f32 %v509_v47, %v510_v51  ;;  %v516_v56 = vrot.slane %v515_v52, 2 }
 0x2c6   :  { %v499_v57 = vmax.f32 %v497_v49, %v498_v53  ;;  %v504_v58 = vrot.slane %v503_v54, 2 }
 0x2c7   :  { %v512_v59 = vrot.slane %v511_v55, 1  ;;  %v517_v60 = vmax.f32 %v515_v52, %v516_v56 }
 0x2c8   :  { %v500_v61 = vrot.slane %v499_v57, 1  ;;  %v505_v62 = vmax.f32 %v503_v54, %v504_v58 }
 0x2c9   :  { %v513_v63 = vmax.f32 %v511_v55, %v512_v59  ;;  %v518_v0 = vrot.slane %v517_v60, 1 }
 0x2ca   :  { %v501_v1 = vmax.f32 %v499_v57, %v500_v61  ;;  %v506_v2 = vrot.slane %v505_v62, 1  ;;  %v707_v3 = vpop.f32.mrb[12].mxu1 }
 0x2cb   :  { %v519_v4 = vmax.f32 %v517_v60, %v518_v0  ;;  %v482_v5 = vadd.f32 %v707_v3, %v636_v32  ;;  %v473_v6 = vpop.f32.mrb[13].mxu1  ;;  %v655_v11 = vpack.c.bf16 %v513_v63, %v513_v63 }
 0x2cc   :  { %v653_v7 = vpack.c.bf16 %v501_v1, %v501_v1  ;;  %v507_v8 = vmax.f32 %v505_v62, %v506_v2  ;;  %v474_v9 = vadd.f32 %v636_v32, %v473_v6  ;;  %v708_v10 = vpop.f32.mrb[14].mxu1 }
 0x2cd   :  { %v494_v12 = vmax.f32 %v482_v5, 0.0  ;;  %v485_v13 = vadd.f32 %v708_v10, %v636_v32  ;;  %v476_v14 = vpop.f32.mrb[15].mxu1  ;;  %v656_v15 = vpack.c.bf16 %v519_v4, %v519_v4  ;;  %v578_v25 = vunpack.c.l.b16 %v655_v11 }
 0x2ce   :  { %v654_v16 = vpack.c.bf16 %v507_v8, %v507_v8  ;;  %v492_v17 = vmax.f32 %v474_v9, 0.0  ;;  %v477_v18 = vadd.f32 %v636_v32, %v476_v14  ;;  %v576_v21 = vunpack.c.l.b16 %v653_v7 }
 0x2cf   :  { %v532_v19 = vrot.slane %v494_v12, 4  ;;  %v495_v20 = vmax.f32 %v485_v13, 0.0  ;;  %v579_v28 = vunpack.c.l.b16 %v656_v15 }
 0x2d0   :  { %v577_v22 = vunpack.c.l.b16 %v654_v16  ;;  %v520_v23 = vrot.slane %v492_v17, 4  ;;  %v493_v24 = vmax.f32 %v477_v18, 0.0 }
 0x2d1   :  { %v533_v26 = vmax.f32 %v494_v12, %v532_v19  ;;  %v538_v27 = vrot.slane %v495_v20, 4 }
 0x2d2   :  { %v585_v29 = vsel %vm584_vm4, %v577_v22, %v576_v21  ;;  %v521_v30 = vmax.f32 %v492_v17, %v520_v23  ;;  %v526_v31 = vrot.slane %v493_v24, 4 }
 0x2d3   :  { %v587_v33 = vsel %vm586_vm5, %v578_v25, %v585_v29  ;;  %v534_v34 = vrot.slane %v533_v26, 2  ;;  %v539_v35 = vmax.f32 %v495_v20, %v538_v27 }
 0x2d4   :  { %v522_v32 = vrot.slane %v521_v30, 2  ;;  %v589_v36 = vsel %vm588_vm6, %v579_v28, %v587_v33  ;;  %v527_v37 = vmax.f32 %v493_v24, %v526_v31 }
 0x2d5   :  { %v535_v38 = vmax.f32 %v533_v26, %v534_v34  ;;  %v540_v39 = vrot.slane %v539_v35, 2 }
 0x2d6   :  { %v523_v40 = vmax.f32 %v521_v30, %v522_v32  ;;  %v528_v41 = vrot.slane %v527_v37, 2 }
 0x2d7   :  { %v536_v42 = vrot.slane %v535_v38, 1  ;;  %v541_v43 = vmax.f32 %v539_v35, %v540_v39 }
 0x2d8   :  { %v524_v44 = vrot.slane %v523_v40, 1  ;;  %v529_v45 = vmax.f32 %v527_v37, %v528_v41 }
 0x2d9   :  { %v537_v46 = vmax.f32 %v535_v38, %v536_v42  ;;  %v542_v47 = vrot.slane %v541_v43, 1 }
 0x2da   :  { %v525_v48 = vmax.f32 %v523_v40, %v524_v44  ;;  %v530_v49 = vrot.slane %v529_v45, 1 }
 0x2db   :  { %v543_v50 = vmax.f32 %v541_v43, %v542_v47  ;;  %v659_v53 = vpack.c.bf16 %v537_v46, %v537_v46 }
 0x2dc   :  { %v657_v51 = vpack.c.bf16 %v525_v48, %v525_v48  ;;  %v531_v52 = vmax.f32 %v529_v45, %v530_v49 }
 0x2dd   :  { %v660_v55 = vpack.c.bf16 %v543_v50, %v543_v50  ;;  %v582_v59 = vunpack.c.l.b16 %v659_v53 }
 0x2de   :  { %v580_v54 = vunpack.c.l.b16 %v657_v51  ;;  %v658_v56 = vpack.c.bf16 %v531_v52, %v531_v52 }
 0x2df   :  { %v583_v60 = vunpack.c.l.b16 %v660_v55 }
 0x2e0   :  { %v591_v57 = vsel %vm590_vm7, %v580_v54, %v589_v36  ;;  %v581_v58 = vunpack.c.l.b16 %v658_v56 }
 0x2e2   :  { %v593_v61 = vsel %vm592_vm8, %v581_v58, %v591_v57 }
 0x2e3   :  { %v595_v62 = vsel %vm594_vm9, %v582_v59, %v593_v61 }
 0x2e4   :  { %v597_v63 = vsel %vm596_vm10, %v583_v60, %v595_v62 }
 0x2e5   :  { %v598_v0 = vpack.c.b16 %v597_v63, %v597_v63 }
 0x2e7   :  { %600 = vst [vmem:[%s888_s7] sm:$0xf] %v598_v0 }

</bundles_post_ra>
